<compile_context>
chip_gen: v7x
topology: tpu7x:2x2x1
jax: 0.10.0
libtpu: 0.0.40
codegen_flags: <defaults>
</compile_context>

<pallas_src>
import jax
import jax.numpy as jnp
from jax import lax
from jax.experimental import pallas as pl
from jax.experimental.pallas import tpu as pltpu


# ----------------------------- Pallas kernels ------------------------------ #

def _make_conv_kernel(th, Wout, Cin, Cout, stride, with_shortcut):
    """Fused 3x3 conv (as 9 tap-dots) + BN bias (+ residual) + ReLU kernel."""
    s = stride

    def kernel(x_ref, w_ref, b_ref, *rest):
        # x_ref: (s*s, Hph, Wph, Cin)   phase-decomposed padded image (1 batch)
        # w_ref: (9, Cin, Cout)         BN scale already folded in
        # b_ref: (1, Cout)              folded BN bias
        # sc_ref (optional): (1, th*Wout, Cout) residual shortcut block
        # o_ref: (1, th*Wout, Cout)
        if with_shortcut:
            sc_ref, o_ref = rest
        else:
            (o_ref,) = rest

        r0 = pl.multiple_of(pl.program_id(1) * th, th)   # first output row of tile

        acc = jnp.zeros((th * Wout, Cout), jnp.float32)
        for dh in range(3):
            a, pa = divmod(dh, s)          # phase row offset / phase index (rows)
            for dw in range(3):
                b, pb = divmod(dw, s)      # phase col offset / phase index (cols)
                tap = x_ref[pa * s + pb, pl.ds(r0 + a, th), b:b + Wout, :]
                acc = acc + jnp.dot(tap.reshape(th * Wout, Cin),
                                    w_ref[dh * 3 + dw],
                                    preferred_element_type=jnp.float32)

        y = acc + b_ref[...]
        if with_shortcut:
            y = y + sc_ref[0].astype(jnp.float32)
        o_ref[0] = jnp.maximum(y, 0.0).astype(o_ref.dtype)

    return kernel


# ------------------------------ JAX glue ----------------------------------- #

def _pick_row_tile(Hout, Wout, max_tile_elems=1024):
    """Largest divisor of Hout s.t. the output tile (th*Wout rows) is modest
    and sublane-aligned (or the full image)."""
    best = Hout
    for d in range(1, Hout + 1):
        if Hout % d:
            continue
        rows = d * Wout
        if rows <= max_tile_elems and (d == Hout or rows % 8 == 0):
            best = d
    return best


def _phase_decompose(x_nhwc, stride):
    """Pad by 1 and (for stride>1) split into stride*stride phase images so the
    kernel's 9 conv taps are all unit-stride slices.  Total bytes ~= padded
    activation (no im2col inflation)."""
    N, H, W, C = x_nhwc.shape
    s = stride
    Hout = (H - 1) // s + 1
    Wout = (W - 1) // s + 1
    halo = 2 // s
    Hph, Wph = Hout + halo, Wout + halo
    pad_h = 1 + max(0, s * Hph - (H + 2))
    pad_w = 1 + max(0, s * Wph - (W + 2))
    xp = jnp.pad(x_nhwc, ((0, 0), (1, pad_h), (1, pad_w), (0, 0)))
    if s == 1:
        phases = xp.reshape(N, 1, Hph, Wph, C)
    else:
        parts = [xp[:, pa:pa + s * Hph:s, pb:pb + s * Wph:s, :]
                 for pa in range(s) for pb in range(s)]
        phases = jnp.stack(parts, axis=1)            # (N, s*s, Hph, Wph, C)
    return phases.reshape(N * s * s, Hph, Wph, C), (Hout, Wout)


def _fold_bn(gamma, beta, mean, var, eps=1e-5):
    scale = gamma / jnp.sqrt(var + eps)
    bias = beta - mean * scale
    return scale, bias.reshape(1, -1)


def _fold_weight(w_oihw, scale):
    """(Cout, Cin, 3, 3) -> (9, Cin, Cout), tap order [dh, dw]; BN scale folded."""
    cout, cin = w_oihw.shape[0], w_oihw.shape[1]
    w = jnp.transpose(w_oihw, (2, 3, 1, 0)).reshape(9, cin, cout)
    return w * scale[None, None, :]


def _conv3x3_bn_act(phases, w9, bias, Hout, Wout, stride, shortcut=None,
                    out_dtype=jnp.float32):
    s = stride
    nphase, Hph, Wph, Cin = phases.shape
    N = nphase // (s * s)
    Cout = w9.shape[2]

    th = _pick_row_tile(Hout, Wout)
    grid = (N, Hout // th)

    kernel = _make_conv_kernel(th, Wout, Cin, Cout, s, shortcut is not None)

    in_specs = [
        # full phase-decomposed image for batch n; resident across row tiles
        pl.BlockSpec((s * s, Hph, Wph, Cin), lambda n, i: (n, 0, 0, 0)),
        # grid-invariant weights / bias
        pl.BlockSpec((9, Cin, Cout), lambda n, i: (0, 0, 0)),
        pl.BlockSpec((1, Cout), lambda n, i: (0, 0)),
    ]
    args = [phases, w9, bias]
    if shortcut is not None:
        in_specs.append(pl.BlockSpec((1, th * Wout, Cout), lambda n, i: (n, i, 0)))
        args.append(shortcut)

    return pl.pallas_call(
        kernel,
        out_shape=jax.ShapeDtypeStruct((N, Hout * Wout, Cout), out_dtype),
        grid_spec=pltpu.PrefetchScalarGridSpec(
            num_scalar_prefetch=0,
            grid=grid,
            in_specs=in_specs,
            out_specs=pl.BlockSpec((1, th * Wout, Cout), lambda n, i: (n, i, 0)),
        ),
        compiler_params=pltpu.CompilerParams(
            dimension_semantics=("parallel", "parallel")),
    )(*args)


def residual_block_forward(x_nchw, params, stride=1, down_sample=False):
    """Pallas-backed equivalent of ResidualBlock.forward (inference BN)."""
    x = jnp.transpose(x_nchw, (0, 2, 3, 1))           # NCHW -> NHWC
    N, H, W, Cin = x.shape
    Cout = params["conv1_w"].shape[0]

    if not down_sample:
        assert Cin == Cout and stride == 1, (
            "identity shortcut requires in_channels == out_channels and stride == 1")

    # conv1 + bn1 + relu (fused Pallas kernel; BN scale folded into weights)
    s1, b1 = _fold_bn(params["bn1_gamma"], params["bn1_beta"],
                      params["bn1_mean"], params["bn1_var"])
    w1 = _fold_weight(params["conv1_w"], s1)
    ph1, (Ho, Wo) = _phase_decompose(x, stride)
    y1 = _conv3x3_bn_act(ph1, w1, b1, Ho, Wo, stride)          # (N, Ho*Wo, Cout)
    y1_img = y1.reshape(N, Ho, Wo, Cout)

    # shortcut: identity, or IdentityPadding (zero channel pad + MaxPool2d(1, stride))
    if down_sample:
        sc = jnp.pad(x, ((0, 0), (0, 0), (0, 0), (0, Cout - Cin)))
        sc = sc[:, ::stride, ::stride, :]
    else:
        sc = x
    sc = sc.reshape(N, Ho * Wo, Cout)

    # conv2 + bn2 + residual add + relu (fused Pallas kernel)
    s2, b2 = _fold_bn(params["bn2_gamma"], params["bn2_beta"],
                      params["bn2_mean"], params["bn2_var"])
    w2 = _fold_weight(params["conv2_w"], s2)
    ph2, _ = _phase_decompose(y1_img, 1)
    y2 = _conv3x3_bn_act(ph2, w2, b2, Ho, Wo, 1, shortcut=sc)  # (N, Ho*Wo, Cout)

    out = y2.reshape(N, Ho, Wo, Cout)
    return jnp.transpose(out, (0, 3, 1, 2))           # NHWC -> NCHW


# --------------------------- parameter init -------------------------------- #

def init_params(key, in_channels, out_channels):
    ks = jax.random.split(key, 10)
    f32 = jnp.float32
    return {
        "conv1_w": 0.1 * jax.random.normal(ks[0], (out_channels, in_channels, 3, 3), f32),
        "conv2_w": 0.1 * jax.random.normal(ks[1], (out_channels, out_channels, 3, 3), f32),
        "bn1_gamma": 1.0 + 0.1 * jax.random.normal(ks[2], (out_channels,), f32),
        "bn1_beta": 0.1 * jax.random.normal(ks[3], (out_channels,), f32),
        "bn1_mean": 0.1 * jax.random.normal(ks[4], (out_channels,), f32),
        "bn1_var": jax.random.uniform(ks[5], (out_channels,), f32, 0.5, 1.5),
        "bn2_gamma": 1.0 + 0.1 * jax.random.normal(ks[6], (out_channels,), f32),
        "bn2_beta": 0.1 * jax.random.normal(ks[7], (out_channels,), f32),
        "bn2_mean": 0.1 * jax.random.normal(ks[8], (out_channels,), f32),
        "bn2_var": jax.random.uniform(ks[9], (out_channels,), f32, 0.5, 1.5),
    }


# --------------------------- pure-JAX reference ----------------------------- #

def reference_forward(x_nchw, params, stride=1, down_sample=False):
    def conv(x, w, s):
        return lax.conv_general_dilated(
            x, w, (s, s), ((1, 1), (1, 1)),
            dimension_numbers=("NCHW", "OIHW", "NCHW"))

    def bn(x, g, b, m, v, eps=1e-5):
        shp = (1, -1, 1, 1)
        return (x - m.reshape(shp)) / jnp.sqrt(v.reshape(shp) + eps) * g.reshape(shp) + b.reshape(shp)

    out = conv(x_nchw, params["conv1_w"], stride)
    out = jax.nn.relu(bn(out, params["bn1_gamma"], params["bn1_beta"],
                         params["bn1_mean"], params["bn1_var"]))
    out = conv(out, params["conv2_w"], 1)
    out = bn(out, params["bn2_gamma"], params["bn2_beta"],
             params["bn2_mean"], params["bn2_var"])
    if down_sample:
        Cin = x_nchw.shape[1]
        Cout = params["conv1_w"].shape[0]
        sc = jnp.pad(x_nchw, ((0, 0), (0, Cout - Cin), (0, 0), (0, 0)))
        sc = sc[:, :, ::stride, ::stride]
    else:
        sc = x_nchw
    return jax.nn.relu(out + sc)


# --------------------------------- main ------------------------------------ #

if __name__ == "__main__":
    key = jax.random.PRNGKey(0)
    kx, kp1, kp2 = jax.random.split(key, 3)

    # Case 1: stride=1, no downsample (in_channels == out_channels == 4)
    x = jax.random.normal(kx, (2, 4, 16, 16), jnp.float32)
    params1 = init_params(kp1, in_channels=4, out_channels=4)
    out1 = residual_block_forward(x, params1, stride=1, down_sample=False)
    out1 = jax.block_until_ready(out1)
    ref1 = reference_forward(x, params1, stride=1, down_sample=False)
    assert out1.shape == (2, 4, 16, 16)
    assert jnp.allclose(out1, ref1, atol=1e-4, rtol=1e-4), \
        float(jnp.max(jnp.abs(out1 - ref1)))

    # Case 2: stride=2 with IdentityPadding downsample (4 -> 8 channels)
    params2 = init_params(kp2, in_channels=4, out_channels=8)
    out2 = residual_block_forward(x, params2, stride=2, down_sample=True)
    out2 = jax.block_until_ready(out2)
    ref2 = reference_forward(x, params2, stride=2, down_sample=True)
    assert out2.shape == (2, 8, 8, 8)
    assert jnp.allclose(out2, ref2, atol=1e-4, rtol=1e-4), \
        float(jnp.max(jnp.abs(out2 - ref2)))

    print("KERNEL_OK")
</pallas_src>

<mosaic_0001>
module attributes {stable_mosaic.version = 11 : i64} {
  func.func @kernel(%arg0: i32, %arg1: i32, %arg2: memref<1x18x18x4xf32, #tpu.memory_space<vmem>>, %arg3: memref<9x4x4xf32, #tpu.memory_space<vmem>>, %arg4: memref<1x4xf32, #tpu.memory_space<vmem>>, %arg5: memref<1x256x4xf32, #tpu.memory_space<vmem>>) attributes {dimension_semantics = [#tpu.dimension_semantics<parallel>, #tpu.dimension_semantics<parallel>], iteration_bounds = array<i64: 2, 1>, scalar_prefetch = 0 : i64, scratch_operands = 0 : i64, tpu.core_type = #tpu.core_type<tc>, window_params = [{transform_indices = @transform_0, window_bounds = array<i64: 1, 18, 18, 4>}, {pipeline_mode = #tpu.pipeline_mode<synchronous>, transform_indices = @transform_1, window_bounds = array<i64: 9, 4, 4>}, {pipeline_mode = #tpu.pipeline_mode<synchronous>, transform_indices = @transform_2, window_bounds = array<i64: 1, 4>}, {transform_indices = @transform_3, window_bounds = array<i64: 1, 256, 4>}]} {
    %c16_i32 = arith.constant 16 : i32
    %0 = arith.muli %arg1, %c16_i32 : i32
    %1 = tpu.assume_multiple %0, 16 : i32
    %cst = arith.constant 0.000000e+00 : f32
    %2 = vector.broadcast %cst : f32 to vector<256x4xf32>
    %c0_i32 = arith.constant 0 : i32
    %3 = arith.addi %1, %c0_i32 : i32
    %c0 = arith.constant 0 : index
    %4 = arith.index_cast %3 : i32 to index
    %c0_0 = arith.constant 0 : index
    %c0_1 = arith.constant 0 : index
    %5 = vector.load %arg2[%c0, %4, %c0_0, %c0_1] : memref<1x18x18x4xf32, #tpu.memory_space<vmem>>, vector<1x16x16x4xf32>
    %6 = vector.shape_cast %5 : vector<1x16x16x4xf32> to vector<16x16x4xf32>
    %7 = vector.shape_cast %6 : vector<16x16x4xf32> to vector<256x4xf32>
    %c0_2 = arith.constant 0 : index
    %c0_3 = arith.constant 0 : index
    %c0_4 = arith.constant 0 : index
    %8 = vector.load %arg3[%c0_2, %c0_3, %c0_4] : memref<9x4x4xf32, #tpu.memory_space<vmem>>, vector<1x4x4xf32>
    %9 = vector.shape_cast %8 : vector<1x4x4xf32> to vector<4x4xf32>
    %cst_5 = arith.constant dense<0.000000e+00> : vector<256x4xf32>
    %10 = tpu.matmul %7, %9, %cst_5 {dimension_numbers = #tpu.dot_dimension_numbers<[1], [0], [0], [1], [0, 0, 1, 1], [], []>} : vector<256x4xf32>, vector<4x4xf32>, vector<256x4xf32> -> vector<256x4xf32>
    %11 = arith.addf %2, %10 : vector<256x4xf32>
    %c0_i32_6 = arith.constant 0 : i32
    %12 = arith.addi %1, %c0_i32_6 : i32
    %c0_7 = arith.constant 0 : index
    %13 = arith.index_cast %12 : i32 to index
    %c1 = arith.constant 1 : index
    %c0_8 = arith.constant 0 : index
    %14 = vector.load %arg2[%c0_7, %13, %c1, %c0_8] : memref<1x18x18x4xf32, #tpu.memory_space<vmem>>, vector<1x16x16x4xf32>
    %15 = vector.shape_cast %14 : vector<1x16x16x4xf32> to vector<16x16x4xf32>
    %16 = vector.shape_cast %15 : vector<16x16x4xf32> to vector<256x4xf32>
    %c1_9 = arith.constant 1 : index
    %c0_10 = arith.constant 0 : index
    %c0_11 = arith.constant 0 : index
    %17 = vector.load %arg3[%c1_9, %c0_10, %c0_11] : memref<9x4x4xf32, #tpu.memory_space<vmem>>, vector<1x4x4xf32>
    %18 = vector.shape_cast %17 : vector<1x4x4xf32> to vector<4x4xf32>
    %cst_12 = arith.constant dense<0.000000e+00> : vector<256x4xf32>
    %19 = tpu.matmul %16, %18, %cst_12 {dimension_numbers = #tpu.dot_dimension_numbers<[1], [0], [0], [1], [0, 0, 1, 1], [], []>} : vector<256x4xf32>, vector<4x4xf32>, vector<256x4xf32> -> vector<256x4xf32>
    %20 = arith.addf %11, %19 : vector<256x4xf32>
    %c0_i32_13 = arith.constant 0 : i32
    %21 = arith.addi %1, %c0_i32_13 : i32
    %c0_14 = arith.constant 0 : index
    %22 = arith.index_cast %21 : i32 to index
    %c2 = arith.constant 2 : index
    %c0_15 = arith.constant 0 : index
    %23 = vector.load %arg2[%c0_14, %22, %c2, %c0_15] : memref<1x18x18x4xf32, #tpu.memory_space<vmem>>, vector<1x16x16x4xf32>
    %24 = vector.shape_cast %23 : vector<1x16x16x4xf32> to vector<16x16x4xf32>
    %25 = vector.shape_cast %24 : vector<16x16x4xf32> to vector<256x4xf32>
    %c2_16 = arith.constant 2 : index
    %c0_17 = arith.constant 0 : index
    %c0_18 = arith.constant 0 : index
    %26 = vector.load %arg3[%c2_16, %c0_17, %c0_18] : memref<9x4x4xf32, #tpu.memory_space<vmem>>, vector<1x4x4xf32>
    %27 = vector.shape_cast %26 : vector<1x4x4xf32> to vector<4x4xf32>
    %cst_19 = arith.constant dense<0.000000e+00> : vector<256x4xf32>
    %28 = tpu.matmul %25, %27, %cst_19 {dimension_numbers = #tpu.dot_dimension_numbers<[1], [0], [0], [1], [0, 0, 1, 1], [], []>} : vector<256x4xf32>, vector<4x4xf32>, vector<256x4xf32> -> vector<256x4xf32>
    %29 = arith.addf %20, %28 : vector<256x4xf32>
    %c1_i32 = arith.constant 1 : i32
    %30 = arith.addi %1, %c1_i32 : i32
    %c0_20 = arith.constant 0 : index
    %31 = arith.index_cast %30 : i32 to index
    %c0_21 = arith.constant 0 : index
    %c0_22 = arith.constant 0 : index
    %32 = vector.load %arg2[%c0_20, %31, %c0_21, %c0_22] : memref<1x18x18x4xf32, #tpu.memory_space<vmem>>, vector<1x16x16x4xf32>
    %33 = vector.shape_cast %32 : vector<1x16x16x4xf32> to vector<16x16x4xf32>
    %34 = vector.shape_cast %33 : vector<16x16x4xf32> to vector<256x4xf32>
    %c3 = arith.constant 3 : index
    %c0_23 = arith.constant 0 : index
    %c0_24 = arith.constant 0 : index
    %35 = vector.load %arg3[%c3, %c0_23, %c0_24] : memref<9x4x4xf32, #tpu.memory_space<vmem>>, vector<1x4x4xf32>
    %36 = vector.shape_cast %35 : vector<1x4x4xf32> to vector<4x4xf32>
    %cst_25 = arith.constant dense<0.000000e+00> : vector<256x4xf32>
    %37 = tpu.matmul %34, %36, %cst_25 {dimension_numbers = #tpu.dot_dimension_numbers<[1], [0], [0], [1], [0, 0, 1, 1], [], []>} : vector<256x4xf32>, vector<4x4xf32>, vector<256x4xf32> -> vector<256x4xf32>
    %38 = arith.addf %29, %37 : vector<256x4xf32>
    %c1_i32_26 = arith.constant 1 : i32
    %39 = arith.addi %1, %c1_i32_26 : i32
    %c0_27 = arith.constant 0 : index
    %40 = arith.index_cast %39 : i32 to index
    %c1_28 = arith.constant 1 : index
    %c0_29 = arith.constant 0 : index
    %41 = vector.load %arg2[%c0_27, %40, %c1_28, %c0_29] : memref<1x18x18x4xf32, #tpu.memory_space<vmem>>, vector<1x16x16x4xf32>
    %42 = vector.shape_cast %41 : vector<1x16x16x4xf32> to vector<16x16x4xf32>
    %43 = vector.shape_cast %42 : vector<16x16x4xf32> to vector<256x4xf32>
    %c4 = arith.constant 4 : index
    %c0_30 = arith.constant 0 : index
    %c0_31 = arith.constant 0 : index
    %44 = vector.load %arg3[%c4, %c0_30, %c0_31] : memref<9x4x4xf32, #tpu.memory_space<vmem>>, vector<1x4x4xf32>
    %45 = vector.shape_cast %44 : vector<1x4x4xf32> to vector<4x4xf32>
    %cst_32 = arith.constant dense<0.000000e+00> : vector<256x4xf32>
    %46 = tpu.matmul %43, %45, %cst_32 {dimension_numbers = #tpu.dot_dimension_numbers<[1], [0], [0], [1], [0, 0, 1, 1], [], []>} : vector<256x4xf32>, vector<4x4xf32>, vector<256x4xf32> -> vector<256x4xf32>
    %47 = arith.addf %38, %46 : vector<256x4xf32>
    %c1_i32_33 = arith.constant 1 : i32
    %48 = arith.addi %1, %c1_i32_33 : i32
    %c0_34 = arith.constant 0 : index
    %49 = arith.index_cast %48 : i32 to index
    %c2_35 = arith.constant 2 : index
    %c0_36 = arith.constant 0 : index
    %50 = vector.load %arg2[%c0_34, %49, %c2_35, %c0_36] : memref<1x18x18x4xf32, #tpu.memory_space<vmem>>, vector<1x16x16x4xf32>
    %51 = vector.shape_cast %50 : vector<1x16x16x4xf32> to vector<16x16x4xf32>
    %52 = vector.shape_cast %51 : vector<16x16x4xf32> to vector<256x4xf32>
    %c5 = arith.constant 5 : index
    %c0_37 = arith.constant 0 : index
    %c0_38 = arith.constant 0 : index
    %53 = vector.load %arg3[%c5, %c0_37, %c0_38] : memref<9x4x4xf32, #tpu.memory_space<vmem>>, vector<1x4x4xf32>
    %54 = vector.shape_cast %53 : vector<1x4x4xf32> to vector<4x4xf32>
    %cst_39 = arith.constant dense<0.000000e+00> : vector<256x4xf32>
    %55 = tpu.matmul %52, %54, %cst_39 {dimension_numbers = #tpu.dot_dimension_numbers<[1], [0], [0], [1], [0, 0, 1, 1], [], []>} : vector<256x4xf32>, vector<4x4xf32>, vector<256x4xf32> -> vector<256x4xf32>
    %56 = arith.addf %47, %55 : vector<256x4xf32>
    %c2_i32 = arith.constant 2 : i32
    %57 = arith.addi %1, %c2_i32 : i32
    %c0_40 = arith.constant 0 : index
    %58 = arith.index_cast %57 : i32 to index
    %c0_41 = arith.constant 0 : index
    %c0_42 = arith.constant 0 : index
    %59 = vector.load %arg2[%c0_40, %58, %c0_41, %c0_42] : memref<1x18x18x4xf32, #tpu.memory_space<vmem>>, vector<1x16x16x4xf32>
    %60 = vector.shape_cast %59 : vector<1x16x16x4xf32> to vector<16x16x4xf32>
    %61 = vector.shape_cast %60 : vector<16x16x4xf32> to vector<256x4xf32>
    %c6 = arith.constant 6 : index
    %c0_43 = arith.constant 0 : index
    %c0_44 = arith.constant 0 : index
    %62 = vector.load %arg3[%c6, %c0_43, %c0_44] : memref<9x4x4xf32, #tpu.memory_space<vmem>>, vector<1x4x4xf32>
    %63 = vector.shape_cast %62 : vector<1x4x4xf32> to vector<4x4xf32>
    %cst_45 = arith.constant dense<0.000000e+00> : vector<256x4xf32>
    %64 = tpu.matmul %61, %63, %cst_45 {dimension_numbers = #tpu.dot_dimension_numbers<[1], [0], [0], [1], [0, 0, 1, 1], [], []>} : vector<256x4xf32>, vector<4x4xf32>, vector<256x4xf32> -> vector<256x4xf32>
    %65 = arith.addf %56, %64 : vector<256x4xf32>
    %c2_i32_46 = arith.constant 2 : i32
    %66 = arith.addi %1, %c2_i32_46 : i32
    %c0_47 = arith.constant 0 : index
    %67 = arith.index_cast %66 : i32 to index
    %c1_48 = arith.constant 1 : index
    %c0_49 = arith.constant 0 : index
    %68 = vector.load %arg2[%c0_47, %67, %c1_48, %c0_49] : memref<1x18x18x4xf32, #tpu.memory_space<vmem>>, vector<1x16x16x4xf32>
    %69 = vector.shape_cast %68 : vector<1x16x16x4xf32> to vector<16x16x4xf32>
    %70 = vector.shape_cast %69 : vector<16x16x4xf32> to vector<256x4xf32>
    %c7 = arith.constant 7 : index
    %c0_50 = arith.constant 0 : index
    %c0_51 = arith.constant 0 : index
    %71 = vector.load %arg3[%c7, %c0_50, %c0_51] : memref<9x4x4xf32, #tpu.memory_space<vmem>>, vector<1x4x4xf32>
    %72 = vector.shape_cast %71 : vector<1x4x4xf32> to vector<4x4xf32>
    %cst_52 = arith.constant dense<0.000000e+00> : vector<256x4xf32>
    %73 = tpu.matmul %70, %72, %cst_52 {dimension_numbers = #tpu.dot_dimension_numbers<[1], [0], [0], [1], [0, 0, 1, 1], [], []>} : vector<256x4xf32>, vector<4x4xf32>, vector<256x4xf32> -> vector<256x4xf32>
    %74 = arith.addf %65, %73 : vector<256x4xf32>
    %c2_i32_53 = arith.constant 2 : i32
    %75 = arith.addi %1, %c2_i32_53 : i32
    %c0_54 = arith.constant 0 : index
    %76 = arith.index_cast %75 : i32 to index
    %c2_55 = arith.constant 2 : index
    %c0_56 = arith.constant 0 : index
    %77 = vector.load %arg2[%c0_54, %76, %c2_55, %c0_56] : memref<1x18x18x4xf32, #tpu.memory_space<vmem>>, vector<1x16x16x4xf32>
    %78 = vector.shape_cast %77 : vector<1x16x16x4xf32> to vector<16x16x4xf32>
    %79 = vector.shape_cast %78 : vector<16x16x4xf32> to vector<256x4xf32>
    %c8 = arith.constant 8 : index
    %c0_57 = arith.constant 0 : index
    %c0_58 = arith.constant 0 : index
    %80 = vector.load %arg3[%c8, %c0_57, %c0_58] : memref<9x4x4xf32, #tpu.memory_space<vmem>>, vector<1x4x4xf32>
    %81 = vector.shape_cast %80 : vector<1x4x4xf32> to vector<4x4xf32>
    %cst_59 = arith.constant dense<0.000000e+00> : vector<256x4xf32>
    %82 = tpu.matmul %79, %81, %cst_59 {dimension_numbers = #tpu.dot_dimension_numbers<[1], [0], [0], [1], [0, 0, 1, 1], [], []>} : vector<256x4xf32>, vector<4x4xf32>, vector<256x4xf32> -> vector<256x4xf32>
    %83 = arith.addf %74, %82 : vector<256x4xf32>
    %c0_60 = arith.constant 0 : index
    %c0_61 = arith.constant 0 : index
    %84 = vector.load %arg4[%c0_60, %c0_61] : memref<1x4xf32, #tpu.memory_space<vmem>>, vector<1x4xf32>
    %85 = vector.broadcast %84 : vector<1x4xf32> to vector<256x4xf32>
    %86 = arith.addf %83, %85 : vector<256x4xf32>
    %cst_62 = arith.constant 0.000000e+00 : f32
    %87 = vector.broadcast %cst_62 : f32 to vector<256x4xf32>
    %88 = arith.maximumf %86, %87 : vector<256x4xf32>
    %c0_63 = arith.constant 0 : index
    %c0_64 = arith.constant 0 : index
    %c0_65 = arith.constant 0 : index
    %89 = vector.load %arg5[%c0_63, %c0_64, %c0_65] : memref<1x256x4xf32, #tpu.memory_space<vmem>>, vector<1x256x4xf32>
    %90 = vector.shape_cast %89 : vector<1x256x4xf32> to vector<256x4xf32>
    %91 = vector.shape_cast %88 : vector<256x4xf32> to vector<1x256x4xf32>
    tpu.vector_store %arg5[%c0_63, %c0_64, %c0_65], %91 {strides = array<i32>} : memref<1x256x4xf32, #tpu.memory_space<vmem>>, vector<1x256x4xf32>,
    return
  }
  func.func @transform_0(%arg0: i32, %arg1: i32) -> (i32, i32, i32, i32) {
    %c0_i32 = arith.constant 0 : i32
    %c0_i32_0 = arith.constant 0 : i32
    %c0_i32_1 = arith.constant 0 : i32
    %c0_i32_2 = arith.constant 0 : i32
    return %arg0, %c0_i32, %c0_i32_0, %c0_i32_1 : i32, i32, i32, i32
  }
  func.func @transform_1(%arg0: i32, %arg1: i32) -> (i32, i32, i32) {
    %c0_i32 = arith.constant 0 : i32
    %c0_i32_0 = arith.constant 0 : i32
    %c0_i32_1 = arith.constant 0 : i32
    %c0_i32_2 = arith.constant 0 : i32
    return %c0_i32, %c0_i32_0, %c0_i32_1 : i32, i32, i32
  }
  func.func @transform_2(%arg0: i32, %arg1: i32) -> (i32, i32) {
    %c0_i32 = arith.constant 0 : i32
    %c0_i32_0 = arith.constant 0 : i32
    %c0_i32_1 = arith.constant 0 : i32
    return %c0_i32, %c0_i32_0 : i32, i32
  }
  func.func @transform_3(%arg0: i32, %arg1: i32) -> (i32, i32, i32) {
    %c0_i32 = arith.constant 0 : i32
    %c0_i32_0 = arith.constant 0 : i32
    return %arg0, %arg1, %c0_i32 : i32, i32, i32
  }
}

</mosaic_0001>

<bundles_post_ra>
// kernel: tpu_custom_call.1
= control target key start
LH: loop header
LB: loop body
LE: loop exit
PB: predicated region body
PF: predicated region fallthrough
CT: control target
= control target key end

     0   :  { %s5427_s12 = smov 0   ;;  %s5429_s13 = smov 0   ;;  %s6506_s0 = inlined_call_operand.vmem [shape: f32[2,18,18,4], index: 0, kind: input, shape index: {}]   ;;  %s6507_s1 = inlined_call_operand.vmem [shape: f32[9,4,4], index: 1, kind: input, shape index: {}]   ;;  %s6508_s2 = inlined_call_operand.vmem [shape: f32[1,4], index: 2, kind: input, shape index: {}]   ;;  %s6509_s3 = inlined_call_operand.vmem [shape: f32[2,256,4], index: 3, kind: output, shape index: {}]  }
   0x1   :  { %s5431_s14 = smov 0  }
   0x2 LB: > { %s25_s15 = sadd.s32 1, %s5401_s13  ;;  %p3848_p0 = scmp.ge.s32.totalorder %s5405_s14, 1  ;;  %s5405_s14 = sphi %s5431_s14, %s13_s14   ;;  %s5401_s13 = sphi %s5429_s13, %s6620_s13   ;;  %s5397_s12 = sphi %s5427_s12, %s6619_s12  }
   0x3   : > { %p27_p1 = scmp.ge.s32.totalorder %s25_s15, 2  ;;  %p151_p2 = scmp.lt.s32.totalorder %s5405_s14, 3 }
   0x5   : > { %s6622_s15 = smov (%p27_p1, %s25_s15), 0  ;;  %p152_p3 = pnand %p3848_p0, %p151_p2 }
   0x7   : > { %155 = sbr.rel (%p152_p3) target bundleno = 526 (0x20e), region = 32 }
   0xe   : > { %v3852_v0 = vld [vmem:[%s6507_s1 + $0x4] sm:$0xf]  ;;  %vm361_vm0 = vcmask 1043456   ;;  %v5451_v1 = vld [vmem:[%s6507_s1 + $0x10] sm:$0xf]  ;;  %p179_p4 = scmp.lt.s32.totalorder %s5397_s12, 1 }
   0xf   : > { %4650 = vmatprep.subr.msk.mxu1 %vm361_vm0, %v3852_v0  ;;  %4850 = vmatprep.subr.msk.mxu0 %vm361_vm0, %v5451_v1  ;;  %v229_v2 = vld [vmem:[%s6507_s1] sm:$0xf]  ;;  %v4117_v3 = vld [vmem:[%s6507_s1 + $0x14] sm:$0xf]  ;;  %vm264_vm1 = vcmask 31744  }
  0x10   : > { %4651 = vmatpush3.msk.msra.mxu1 %vm361_vm0, %v3852_v0  ;;  %4851 = vmatpush3.msk.msra.mxu0 %vm361_vm0, %v5451_v1  ;;  %s6624_s12 = smov (!%p179_p4, %s5397_s12), 1  ;;  %v4183_v9 = vld [vmem:[%s6507_s1 + $0x18] sm:$0xf]  ;;  %v5492_v10 = vld [vmem:[%s6507_s1 + $0x8] sm:$0xf] }
  0x11   : > { %4700 = vmatprep.subr.msk.mxu1 %vm361_vm0, %v229_v2  ;;  %4900 = vmatprep.subr.msk.mxu0 %vm361_vm0, %v4117_v3  ;;  %s5358_s24 = smul.u32 432, %s6624_s12  ;;  %v5611_v28 = vld [vmem:[%s6507_s1 + $0x1c] sm:$0xf]  ;;  %v5774_v61 = vld [vmem:[%s6507_s1 + $0xc] sm:$0xf]  ;;  %s4352_s17 = sshll.u32 %s6624_s12, 8 }
  0x12   : > { %s6396_s20 = scalar_lea.vmem %s6509_s3, %s4352_s17 }
  0x13   : > { %s5473_s27 = scalar_lea.vmem %s6506_s0, %s5358_s24 }
  0x14   : > { %v230_v4 = vld [vmem:[%s5473_s27 + $0x1] sm:$0xff]  ;;  %v4019_v5 = vld [vmem:[%s5473_s27 + $0x19] sm:$0xff]  ;;  %v231_v6 = vld [vmem:[%s5473_s27 + $0x9] sm:$0xff] }
  0x15   : > { %4652 = vmatprep.mubr.msk.f32.mxu1 %vm264_vm1, %v230_v4  ;;  %4852 = vmatprep.mubr.msk.f32.mxu0 %vm264_vm1, %v4019_v5  ;;  %v4020_v7 = vld [vmem:[%s5473_s27 + $0x21] sm:$0xff]  ;;  %v5482_v8 = vld [vmem:[%s5473_s27 + $0x31] sm:$0xff]  ;;  %v5497_v11 = vld [vmem:[%s5473_s27 + $0x39] sm:$0xff] }
  0x16   : > { %4653 = vmatmul.mubr.msk.f32.vlgmr.msra.gmra.mrb[0].mxu1 %vm264_vm1, %v231_v6  ;;  %4853 = vmatmul.mubr.msk.f32.vlgmr.msra.gmra.mrb[0].mxu0 %vm264_vm1, %v4020_v7  ;;  %v5503_v12 = vld [vmem:[%s5473_s27 + $0x49] sm:$0xff]  ;;  %v5516_v13 = vld [vmem:[%s5473_s27 + $0x51] sm:$0xff]  ;;  %v5519_v14 = vld [vmem:[%s5473_s27 + $0x61] sm:$0xff] }
  0x17   : > { %4701 = vmatpush3.msk.msra.mxu1 %vm361_vm0, %v229_v2  ;;  %4901 = vmatpush3.msk.msra.mxu0 %vm361_vm0, %v4117_v3  ;;  %v5530_v15 = vld [vmem:[%s5473_s27 + $0x69] sm:$0xff]  ;;  %v5533_v16 = vld [vmem:[%s5473_s27 + $0x79] sm:$0xff]  ;;  %v5544_v17 = vld [vmem:[%s5473_s27 + $0x81] sm:$0xff] }
  0x18   : > { %4655 = vmatprep.mubr.msk.f32.mxu1 %vm264_vm1, %v4019_v5  ;;  %4855 = vmatprep.mubr.msk.f32.mxu0 %vm264_vm1, %v5482_v8  ;;  %v5547_v18 = vld [vmem:[%s5473_s27 + $0x91] sm:$0xff]  ;;  %v5558_v19 = vld [vmem:[%s5473_s27 + $0x99] sm:$0xff]  ;;  %v5561_v20 = vld [vmem:[%s5473_s27 + $0xa9] sm:$0xff] }
  0x19   : > { %4950 = vmatprep.subr.msk.mxu0 %vm361_vm0, %v4183_v9  ;;  %4750 = vmatprep.subr.msk.mxu1 %vm361_vm0, %v5492_v10  ;;  %v5572_v21 = vld [vmem:[%s5473_s27 + $0xb1] sm:$0xff]  ;;  %v5575_v22 = vld [vmem:[%s5473_s27 + $0xc1] sm:$0xff]  ;;  %v5586_v23 = vld [vmem:[%s5473_s27 + $0xc9] sm:$0xff] }
  0x1a   : > { %4656 = vmatmul.mubr.msk.f32.gmra.mrb[2].mxu1 %vm264_vm1, %v4020_v7  ;;  %4856 = vmatmul.mubr.msk.f32.gmra.mrb[2].mxu0 %vm264_vm1, %v5497_v11  ;;  %v5589_v24 = vld [vmem:[%s5473_s27 + $0x1a] sm:$0xff]  ;;  %v5600_v25 = vld [vmem:[%s5473_s27 + $0x22] sm:$0xff]  ;;  %v5606_v27 = vld [vmem:[%s5473_s27 + $0x32] sm:$0xff] }
  0x1b   : > { %4658 = vmatprep.mubr.msk.f32.mxu1 %vm264_vm1, %v5482_v8  ;;  %4858 = vmatprep.mubr.msk.f32.mxu0 %vm264_vm1, %v5503_v12  ;;  %v5603_v26 = vld [vmem:[%s5473_s27 + $0xd9] sm:$0xff]  ;;  %v5621_v29 = vld [vmem:[%s5473_s27 + $0xe1] sm:$0xff]  ;;  %v5629_v31 = vld [vmem:[%s5473_s27 + $0xf1] sm:$0xff] }
  0x1c   : > { %6555 = vst [vmem:[#allocation2_spill] sm:$0xff] %v5621_v29  ;;  %v5624_v30 = vld [vmem:[%s5473_s27 + $0x3a] sm:$0xff]  ;;  %6556 = vst [vmem:[#allocation3_spill] sm:$0xff] %v5629_v31  ;;  %v5632_v32 = vld [vmem:[%s5473_s27 + $0x4a] sm:$0xff] }
  0x1d   : > { %v5645_v33 = vld [vmem:[%s5473_s27 + $0xf9] sm:$0xff]  ;;  %v5651_v35 = vld [vmem:[%s5473_s27 + $0x109] sm:$0xff]  ;;  %v5665_v37 = vld [vmem:[%s5473_s27 + $0x111] sm:$0xff] }
  0x1e   : > { %4659 = vmatmul.mubr.msk.f32.gmra.mrb[4].mxu1 %vm264_vm1, %v5497_v11  ;;  %4859 = vmatmul.mubr.msk.f32.gmra.mrb[4].mxu0 %vm264_vm1, %v5516_v13  ;;  %6557 = vst [vmem:[#allocation4_spill] sm:$0xff] %v5645_v33  ;;  %v5648_v34 = vld [vmem:[%s5473_s27 + $0x52] sm:$0xff]  ;;  %6558 = vst [vmem:[#allocation5_spill] sm:$0xff] %v5651_v35  ;;  %v5654_v36 = vld [vmem:[%s5473_s27 + $0x62] sm:$0xff] }
  0x1f   : > { %4661 = vmatprep.mubr.msk.f32.mxu1 %vm264_vm1, %v5503_v12  ;;  %4861 = vmatprep.mubr.msk.f32.mxu0 %vm264_vm1, %v5519_v14  ;;  %6559 = vst [vmem:[#allocation6_spill] sm:$0xff] %v5665_v37  ;;  %v5668_v38 = vld [vmem:[%s5473_s27 + $0x6a] sm:$0xff]  ;;  %v5671_v39 = vld [vmem:[%s5473_s27 + $0x121] sm:$0xff]  ;;  %v5691_v43 = vld [vmem:[%s5473_s27 + $0x139] sm:$0xff] }
  0x20   : > { %6560 = vst [vmem:[#allocation7_spill] sm:$0xff] %v5671_v39  ;;  %v5674_v40 = vld [vmem:[%s5473_s27 + $0x7a] sm:$0xff]  ;;  %v5685_v41 = vld [vmem:[%s5473_s27 + $0x129] sm:$0xff]  ;;  %6562 = vst [vmem:[#allocation9_spill] sm:$0xff] %v5691_v43 }
  0x21   : > { %6561 = vst [vmem:[#allocation8_spill] sm:$0xff] %v5685_v41  ;;  %v5688_v42 = vld [vmem:[%s5473_s27 + $0x82] sm:$0xff]  ;;  %v5694_v44 = vld [vmem:[%s5473_s27 + $0x92] sm:$0xff]  ;;  %v5708_v46 = vld [vmem:[%s5473_s27 + $0x9a] sm:$0xff] }
  0x22   : > { %4662 = vmatmul.mubr.msk.f32.gmra.mrb[6].mxu1 %vm264_vm1, %v5516_v13  ;;  %4862 = vmatmul.mubr.msk.f32.gmra.mrb[6].mxu0 %vm264_vm1, %v5530_v15  ;;  %v5705_v45 = vld [vmem:[%s5473_s27 + $0x141] sm:$0xff]  ;;  %v5711_v47 = vld [vmem:[%s5473_s27 + $0x151] sm:$0xff]  ;;  %v5725_v49 = vld [vmem:[%s5473_s27 + $0x159] sm:$0xff] }
  0x23   : > { %4664 = vmatprep.mubr.msk.f32.mxu1 %vm264_vm1, %v5519_v14  ;;  %4864 = vmatprep.mubr.msk.f32.mxu0 %vm264_vm1, %v5533_v16  ;;  %6563 = vst [vmem:[#allocation10_spill] sm:$0xff] %v5705_v45  ;;  %6564 = vst [vmem:[#allocation11_spill] sm:$0xff] %v5711_v47  ;;  %v5714_v48 = vld [vmem:[%s5473_s27 + $0xaa] sm:$0xff]  ;;  %v5728_v50 = vld [vmem:[%s5473_s27 + $0xb2] sm:$0xff] }
  0x24   : > { %6565 = vst [vmem:[#allocation12_spill] sm:$0xff] %v5725_v49  ;;  %v5731_v51 = vld [vmem:[%s5473_s27 + $0x169] sm:$0xff]  ;;  %v5745_v53 = vld [vmem:[%s5473_s27 + $0x171] sm:$0xff]  ;;  %v197_v55 = vld [vmem:[%s5473_s27] sm:$0xff] }
  0x25   : > { %6566 = vst [vmem:[#allocation13_spill] sm:$0xff] %v5731_v51  ;;  %v5734_v52 = vld [vmem:[%s5473_s27 + $0xc2] sm:$0xff]  ;;  %6567 = vst [vmem:[#allocation14_spill] sm:$0xff] %v5745_v53  ;;  %v5748_v54 = vld [vmem:[%s5473_s27 + $0xca] sm:$0xff] }
  0x26   : > { %4665 = vmatmul.mubr.msk.f32.gmra.mrb[8].mxu1 %vm264_vm1, %v5530_v15  ;;  %4865 = vmatmul.mubr.msk.f32.gmra.mrb[8].mxu0 %vm264_vm1, %v5544_v17  ;;  %v5752_v56 = vld [vmem:[%s5473_s27 + $0xda] sm:$0xff]  ;;  %v198_v57 = vld [vmem:[%s5473_s27 + $0x8] sm:$0xff]  ;;  %v5769_v60 = vld [vmem:[%s5473_s27 + $0xf2] sm:$0xff] }
  0x27   : > { %4667 = vmatprep.mubr.msk.f32.mxu1 %vm264_vm1, %v5533_v16  ;;  %4867 = vmatprep.mubr.msk.f32.mxu0 %vm264_vm1, %v5547_v18  ;;  %v5763_v58 = vld [vmem:[%s5473_s27 + $0xe2] sm:$0xff]  ;;  %v5766_v59 = vld [vmem:[%s5473_s27 + $0x18] sm:$0xff]  ;;  %v5792_v0 = vld [vmem:[%s5473_s27 + $0x30] sm:$0xff] }
  0x28   : > { %6568 = vst [vmem:[#allocation15_spill] sm:$0xff] %v5766_v59  ;;  %v5784_v62 = vld [vmem:[%s5473_s27 + $0x20] sm:$0xff]  ;;  %6570 = vst [vmem:[#allocation17_spill] sm:$0xff] %v5792_v0  ;;  %v5795_v2 = vld [vmem:[%s5473_s27 + $0x10a] sm:$0xff] }
  0x29   : > { %6569 = vst [vmem:[#allocation16_spill] sm:$0xff] %v5784_v62  ;;  %v5787_v63 = vld [vmem:[%s5473_s27 + $0xfa] sm:$0xff]  ;;  %v5811_v4 = vld [vmem:[%s5473_s27 + $0x112] sm:$0xff]  ;;  %v5814_v5 = vld [vmem:[%s5473_s27 + $0x48] sm:$0xff] }
  0x2a   : > { %4668 = vmatmul.mubr.msk.f32.gmra.mrb[10].mxu1 %vm264_vm1, %v5544_v17  ;;  %4868 = vmatmul.mubr.msk.f32.gmra.mrb[10].mxu0 %vm264_vm1, %v5558_v19  ;;  %v5808_v3 = vld [vmem:[%s5473_s27 + $0x38] sm:$0xff]  ;;  %6572 = vst [vmem:[#allocation19_spill] sm:$0xff] %v5814_v5  ;;  %v5817_v6 = vld [vmem:[%s5473_s27 + $0x122] sm:$0xff]  ;;  %v5828_v7 = vld [vmem:[%s5473_s27 + $0x50] sm:$0xff] }
  0x2b   : > { %4670 = vmatprep.mubr.msk.f32.mxu1 %vm264_vm1, %v5547_v18  ;;  %4870 = vmatprep.mubr.msk.f32.mxu0 %vm264_vm1, %v5561_v20  ;;  %6571 = vst [vmem:[#allocation18_spill] sm:$0xff] %v5808_v3  ;;  %6573 = vst [vmem:[#allocation20_spill] sm:$0xff] %v5828_v7 }
  0x2e   : > { %4671 = vmatmul.mubr.msk.f32.gmra.mrb[12].mxu1 %vm264_vm1, %v5558_v19  ;;  %4871 = vmatmul.mubr.msk.f32.gmra.mrb[12].mxu0 %vm264_vm1, %v5572_v21 }
  0x2f   : > { %4673 = vmatprep.mubr.msk.f32.mxu1 %vm264_vm1, %v5561_v20  ;;  %4873 = vmatprep.mubr.msk.f32.mxu0 %vm264_vm1, %v5575_v22 }
  0x32   : > { %4674 = vmatmul.mubr.msk.f32.gmra.mrb[14].mxu1 %vm264_vm1, %v5572_v21  ;;  %4874 = vmatmul.mubr.msk.f32.gmra.mrb[14].mxu0 %vm264_vm1, %v5586_v23 }
  0x33   : > { %4676 = vmatprep.mubr.msk.f32.mxu1 %vm264_vm1, %v5575_v22  ;;  %4902 = vmatprep.mubr.msk.f32.mxu0 %vm264_vm1, %v5589_v24 }
  0x36   : > { %4677 = vmatmul.mubr.msk.f32.gmra.mrb[16].mxu1 %vm264_vm1, %v5586_v23  ;;  %4903 = vmatmul.mubr.msk.f32.vlgmr.msra.gmra.mrb[0].mxu0 %vm264_vm1, %v5600_v25 }
  0x37   : > { %4951 = vmatpush3.msk.msra.mxu0 %vm361_vm0, %v4183_v9  ;;  %4679 = vmatprep.mubr.msk.f32.mxu1 %vm264_vm1, %v5603_v26  ;;  %v5831_v9 = vld [vmem:[%s5473_s27 + $0x12a] sm:$0xff] }
  0x38   : > { %4905 = vmatprep.mubr.msk.f32.mxu0 %vm264_vm1, %v5606_v27  ;;  %5000 = vmatprep.subr.msk.mxu0 %vm361_vm0, %v5611_v28 }
  0x3a   : > { %4680 = vmatmul.mubr.msk.f32.gmra.mrb[18].mxu1 %vm264_vm1, %v5621_v29  ;;  %4906 = vmatmul.mubr.msk.f32.gmra.mrb[2].mxu0 %vm264_vm1, %v5624_v30  ;;  %v5928_v29 = vld [vmem:[%s5473_s27 + $0xd8] sm:$0xff] }
  0x3b   : > { %4682 = vmatprep.mubr.msk.f32.mxu1 %vm264_vm1, %v5629_v31  ;;  %4908 = vmatprep.mubr.msk.f32.mxu0 %vm264_vm1, %v5632_v32  ;;  %v5911_v31 = vld [vmem:[%s5473_s27 + $0x18a] sm:$0xff] }
  0x3c   : > { %6584 = vst [vmem:[#allocation31_spill] sm:$0xff] %v5911_v31 }
  0x3e   : > { %4683 = vmatmul.mubr.msk.f32.gmra.mrb[20].mxu1 %vm264_vm1, %v5645_v33  ;;  %4909 = vmatmul.mubr.msk.f32.gmra.mrb[4].mxu0 %vm264_vm1, %v5648_v34  ;;  %v5897_v33 = vld [vmem:[%s5473_s27 + $0x182] sm:$0xff] }
  0x3f   : > { %4685 = vmatprep.mubr.msk.f32.mxu1 %vm264_vm1, %v5651_v35  ;;  %4911 = vmatprep.mubr.msk.f32.mxu0 %vm264_vm1, %v5654_v36  ;;  %v5894_v35 = vld [vmem:[%s5473_s27 + $0xa8] sm:$0xff]  ;;  %6582 = vst [vmem:[#allocation29_spill] sm:$0xff] %v5897_v33 }
  0x40   : > { %6581 = vst [vmem:[#allocation28_spill] sm:$0xff] %v5894_v35 }
  0x42   : > { %4686 = vmatmul.mubr.msk.f32.gmra.mrb[22].mxu1 %vm264_vm1, %v5665_v37  ;;  %4912 = vmatmul.mubr.msk.f32.gmra.mrb[6].mxu0 %vm264_vm1, %v5668_v38  ;;  %v5891_v37 = vld [vmem:[%s5473_s27 + $0x172] sm:$0xff] }
  0x43   : > { %4688 = vmatprep.mubr.msk.f32.mxu1 %vm264_vm1, %v5671_v39  ;;  %4914 = vmatprep.mubr.msk.f32.mxu0 %vm264_vm1, %v5674_v40  ;;  %v5888_v39 = vld [vmem:[%s5473_s27 + $0x98] sm:$0xff]  ;;  %6580 = vst [vmem:[#allocation27_spill] sm:$0xff] %v5891_v37 }
  0x44   : > { %6579 = vst [vmem:[#allocation26_spill] sm:$0xff] %v5888_v39 }
  0x46   : > { %4689 = vmatmul.mubr.msk.f32.gmra.mrb[24].mxu1 %vm264_vm1, %v5685_v41  ;;  %4915 = vmatmul.mubr.msk.f32.gmra.mrb[8].mxu0 %vm264_vm1, %v5688_v42  ;;  %v5877_v41 = vld [vmem:[%s5473_s27 + $0x16a] sm:$0xff] }
  0x47   : > { %4691 = vmatprep.mubr.msk.f32.mxu1 %vm264_vm1, %v5691_v43  ;;  %4917 = vmatprep.mubr.msk.f32.mxu0 %vm264_vm1, %v5694_v44  ;;  %v5874_v43 = vld [vmem:[%s5473_s27 + $0x90] sm:$0xff] }
  0x48   : > { %6578 = vst [vmem:[#allocation25_spill] sm:$0xff] %v5874_v43 }
  0x4a   : > { %4692 = vmatmul.mubr.msk.f32.gmra.mrb[26].mxu1 %vm264_vm1, %v5705_v45  ;;  %4918 = vmatmul.mubr.msk.f32.gmra.mrb[10].mxu0 %vm264_vm1, %v5708_v46  ;;  %v5871_v45 = vld [vmem:[%s5473_s27 + $0x15a] sm:$0xff] }
  0x4b   : > { %4694 = vmatprep.mubr.msk.f32.mxu1 %vm264_vm1, %v5711_v47  ;;  %4920 = vmatprep.mubr.msk.f32.mxu0 %vm264_vm1, %v5714_v48  ;;  %v5868_v47 = vld [vmem:[%s5473_s27 + $0x80] sm:$0xff] }
  0x4c   : > { %6577 = vst [vmem:[#allocation24_spill] sm:$0xff] %v5868_v47 }
  0x4e   : > { %4695 = vmatmul.mubr.msk.f32.gmra.mrb[28].mxu1 %vm264_vm1, %v5725_v49  ;;  %4921 = vmatmul.mubr.msk.f32.gmra.mrb[12].mxu0 %vm264_vm1, %v5728_v50  ;;  %v5857_v49 = vld [vmem:[%s5473_s27 + $0x152] sm:$0xff] }
  0x4f   : > { %4697 = vmatprep.mubr.msk.f32.mxu1 %vm264_vm1, %v5731_v51  ;;  %4923 = vmatprep.mubr.msk.f32.mxu0 %vm264_vm1, %v5734_v52  ;;  %v5854_v51 = vld [vmem:[%s5473_s27 + $0x78] sm:$0xff] }
  0x50   : > { %6576 = vst [vmem:[#allocation23_spill] sm:$0xff] %v5854_v51 }
  0x52   : > { %4698 = vmatmul.mubr.msk.f32.gmra.mrb[30].mxu1 %vm264_vm1, %v5745_v53  ;;  %4924 = vmatmul.mubr.msk.f32.gmra.mrb[14].mxu0 %vm264_vm1, %v5748_v54  ;;  %v5851_v53 = vld [vmem:[%s5473_s27 + $0x142] sm:$0xff] }
  0x53   : > { %4702 = vmatprep.mubr.msk.f32.mxu1 %vm264_vm1, %v197_v55  ;;  %4926 = vmatprep.mubr.msk.f32.mxu0 %vm264_vm1, %v5752_v56  ;;  %v5837_v55 = vld [vmem:[%s5473_s27 + $0x13a] sm:$0xff] }
  0x56   : > { %4703 = vmatmul.mubr.msk.f32.vlgmr.msra.gmra.mrb[0].mxu1 %vm264_vm1, %v198_v57  ;;  %4927 = vmatmul.mubr.msk.f32.gmra.mrb[16].mxu0 %vm264_vm1, %v5763_v58  ;;  %v5848_v57 = vld [vmem:[%s5473_s27 + $0x68] sm:$0xff] }
  0x57   : > { %4751 = vmatpush3.msk.msra.mxu1 %vm361_vm0, %v5492_v10  ;;  %4705 = vmatprep.mubr.msk.f32.mxu1 %vm264_vm1, %v5766_v59  ;;  %v5834_v10 = vld [vmem:[%s5473_s27 + $0x60] sm:$0xff]  ;;  %6575 = vst [vmem:[#allocation22_spill] sm:$0xff] %v5848_v57 }
  0x58   : > { %4929 = vmatprep.mubr.msk.f32.mxu0 %vm264_vm1, %v5769_v60  ;;  %4800 = vmatprep.subr.msk.mxu1 %vm361_vm0, %v5774_v61  ;;  %6574 = vst [vmem:[#allocation21_spill] sm:$0xff] %v5834_v10  ;;  %v5914_v59 = vld [vmem:[%s5473_s27 + $0xc0] sm:$0xff] }
  0x5a   : > { %4706 = vmatmul.mubr.msk.f32.gmra.mrb[2].mxu1 %vm264_vm1, %v5784_v62  ;;  %4930 = vmatmul.mubr.msk.f32.gmra.mrb[18].mxu0 %vm264_vm1, %v5787_v63  ;;  %v5908_v62 = vld [vmem:[%s5473_s27 + $0xb0] sm:$0xff] }
  0x5b   : > { %4708 = vmatprep.mubr.msk.f32.mxu1 %vm264_vm1, %v5792_v0  ;;  %4932 = vmatprep.mubr.msk.f32.mxu0 %vm264_vm1, %v5795_v2  ;;  %6583 = vst [vmem:[#allocation30_spill] sm:$0xff] %v5908_v62 }
  0x5e   : > { %4709 = vmatmul.mubr.msk.f32.gmra.mrb[4].mxu1 %vm264_vm1, %v5808_v3  ;;  %4933 = vmatmul.mubr.msk.f32.gmra.mrb[20].mxu0 %vm264_vm1, %v5811_v4 }
  0x5f   : > { %4711 = vmatprep.mubr.msk.f32.mxu1 %vm264_vm1, %v5814_v5  ;;  %4935 = vmatprep.mubr.msk.f32.mxu0 %vm264_vm1, %v5817_v6 }
  0x62   : > { %4712 = vmatmul.mubr.msk.f32.gmra.mrb[6].mxu1 %vm264_vm1, %v5828_v7  ;;  %4936 = vmatmul.mubr.msk.f32.gmra.mrb[22].mxu0 %vm264_vm1, %v5831_v9 }
  0x63   : > { %4714 = vmatprep.mubr.msk.f32.mxu1 %vm264_vm1, %v5834_v10  ;;  %4938 = vmatprep.mubr.msk.f32.mxu0 %vm264_vm1, %v5837_v55 }
  0x66   : > { %4715 = vmatmul.mubr.msk.f32.gmra.mrb[8].mxu1 %vm264_vm1, %v5848_v57  ;;  %4939 = vmatmul.mubr.msk.f32.gmra.mrb[24].mxu0 %vm264_vm1, %v5851_v53 }
  0x67   : > { %4717 = vmatprep.mubr.msk.f32.mxu1 %vm264_vm1, %v5854_v51  ;;  %4941 = vmatprep.mubr.msk.f32.mxu0 %vm264_vm1, %v5857_v49 }
  0x6a   : > { %4718 = vmatmul.mubr.msk.f32.gmra.mrb[10].mxu1 %vm264_vm1, %v5868_v47  ;;  %4942 = vmatmul.mubr.msk.f32.gmra.mrb[26].mxu0 %vm264_vm1, %v5871_v45 }
  0x6b   : > { %4720 = vmatprep.mubr.msk.f32.mxu1 %vm264_vm1, %v5874_v43  ;;  %4944 = vmatprep.mubr.msk.f32.mxu0 %vm264_vm1, %v5877_v41 }
  0x6e   : > { %4721 = vmatmul.mubr.msk.f32.gmra.mrb[12].mxu1 %vm264_vm1, %v5888_v39  ;;  %4945 = vmatmul.mubr.msk.f32.gmra.mrb[28].mxu0 %vm264_vm1, %v5891_v37  ;;  %v5933_v37 = vld [vmem:[%s6507_s1 + $0x20] sm:$0xf] }
  0x6f   : > { %4723 = vmatprep.mubr.msk.f32.mxu1 %vm264_vm1, %v5894_v35  ;;  %4947 = vmatprep.mubr.msk.f32.mxu0 %vm264_vm1, %v5897_v33  ;;  %v5925_v33 = vld [vmem:[%s5473_s27 + $0xc8] sm:$0xff] }
  0x70   : > { %6585 = vst [vmem:[#allocation32_spill] sm:$0xff] %v5925_v33 }
  0x72   : > { %4724 = vmatmul.mubr.msk.f32.gmra.mrb[14].mxu1 %vm264_vm1, %v5908_v62  ;;  %4948 = vmatmul.mubr.msk.f32.gmra.mrb[30].mxu0 %vm264_vm1, %v5911_v31  ;;  %v5944_v31 = vld [vmem:[%s5473_s27 + $0xe0] sm:$0xff] }
  0x73   : > { %4726 = vmatprep.mubr.msk.f32.mxu1 %vm264_vm1, %v5914_v59  ;;  %4952 = vmatprep.mubr.msk.f32.mxu0 %vm264_vm1, %v5792_v0  ;;  %v5949_v0 = vld [vmem:[%s5473_s27 + $0xf0] sm:$0xff] }
  0x76   : > { %4727 = vmatmul.mubr.msk.f32.gmra.mrb[16].mxu1 %vm264_vm1, %v5925_v33  ;;  %4953 = vmatmul.mubr.msk.f32.vlgmr.msra.gmra.mrb[0].mxu0 %vm264_vm1, %v5808_v3  ;;  %v914_v3 = vld [vmem:[%s5473_s27 + $0x2] sm:$0xff] }
  0x77   : > { %5001 = vmatpush3.msk.msra.mxu0 %vm361_vm0, %v5611_v28  ;;  %4729 = vmatprep.mubr.msk.f32.mxu1 %vm264_vm1, %v5928_v29  ;;  %v5962_v28 = vld [vmem:[%s5473_s27 + $0xf8] sm:$0xff] }
  0x78   : > { %4955 = vmatprep.mubr.msk.f32.mxu0 %vm264_vm1, %v5814_v5  ;;  %5050 = vmatprep.subr.msk.mxu0 %vm361_vm0, %v5933_v37  ;;  %v5965_v5 = vld [vmem:[%s5473_s27 + $0x108] sm:$0xff] }
  0x7a   : > { %4730 = vmatmul.mubr.msk.f32.gmra.mrb[18].mxu1 %vm264_vm1, %v5944_v31  ;;  %4956 = vmatmul.mubr.msk.f32.gmra.mrb[2].mxu0 %vm264_vm1, %v5828_v7  ;;  %v5976_v7 = vld [vmem:[%s5473_s27 + $0x110] sm:$0xff] }
  0x7b   : > { %4732 = vmatprep.mubr.msk.f32.mxu1 %vm264_vm1, %v5949_v0  ;;  %4958 = vmatprep.mubr.msk.f32.mxu0 %vm264_vm1, %v5834_v10  ;;  %v5979_v10 = vld [vmem:[%s5473_s27 + $0x120] sm:$0xff] }
  0x7e   : > { %4733 = vmatmul.mubr.msk.f32.gmra.mrb[20].mxu1 %vm264_vm1, %v5962_v28  ;;  %4959 = vmatmul.mubr.msk.f32.gmra.mrb[4].mxu0 %vm264_vm1, %v5848_v57  ;;  %v5990_v57 = vld [vmem:[%s5473_s27 + $0x128] sm:$0xff] }
  0x7f   : > { %4735 = vmatprep.mubr.msk.f32.mxu1 %vm264_vm1, %v5965_v5  ;;  %4961 = vmatprep.mubr.msk.f32.mxu0 %vm264_vm1, %v5854_v51  ;;  %v5993_v51 = vld [vmem:[%s5473_s27 + $0x138] sm:$0xff] }
  0x82   : > { %4736 = vmatmul.mubr.msk.f32.gmra.mrb[22].mxu1 %vm264_vm1, %v5976_v7  ;;  %4962 = vmatmul.mubr.msk.f32.gmra.mrb[6].mxu0 %vm264_vm1, %v5868_v47  ;;  %v6004_v47 = vld [vmem:[%s5473_s27 + $0x140] sm:$0xff] }
  0x83   : > { %4738 = vmatprep.mubr.msk.f32.mxu1 %vm264_vm1, %v5979_v10  ;;  %4964 = vmatprep.mubr.msk.f32.mxu0 %vm264_vm1, %v5874_v43  ;;  %v6007_v43 = vld [vmem:[%s5473_s27 + $0x150] sm:$0xff] }
  0x86   : > { %4739 = vmatmul.mubr.msk.f32.gmra.mrb[24].mxu1 %vm264_vm1, %v5990_v57  ;;  %4965 = vmatmul.mubr.msk.f32.gmra.mrb[8].mxu0 %vm264_vm1, %v5888_v39  ;;  %v6018_v39 = vld [vmem:[%s5473_s27 + $0x158] sm:$0xff] }
  0x87   : > { %4741 = vmatprep.mubr.msk.f32.mxu1 %vm264_vm1, %v5993_v51  ;;  %4967 = vmatprep.mubr.msk.f32.mxu0 %vm264_vm1, %v5894_v35  ;;  %v6021_v35 = vld [vmem:[%s5473_s27 + $0x168] sm:$0xff] }
  0x8a   : > { %4742 = vmatmul.mubr.msk.f32.gmra.mrb[26].mxu1 %vm264_vm1, %v6004_v47  ;;  %4968 = vmatmul.mubr.msk.f32.gmra.mrb[10].mxu0 %vm264_vm1, %v5908_v62  ;;  %v6032_v62 = vld [vmem:[%s5473_s27 + $0x170] sm:$0xff] }
  0x8b   : > { %4744 = vmatprep.mubr.msk.f32.mxu1 %vm264_vm1, %v6007_v43  ;;  %4970 = vmatprep.mubr.msk.f32.mxu0 %vm264_vm1, %v5914_v59 }
  0x8e   : > { %4745 = vmatmul.mubr.msk.f32.gmra.mrb[28].mxu1 %vm264_vm1, %v6018_v39  ;;  %4971 = vmatmul.mubr.msk.f32.gmra.mrb[12].mxu0 %vm264_vm1, %v5925_v33  ;;  %v915_v33 = vld [vmem:[%s5473_s27 + $0xa] sm:$0xff] }
  0x8f   : > { %4747 = vmatprep.mubr.msk.f32.mxu1 %vm264_vm1, %v6021_v35  ;;  %4973 = vmatprep.mubr.msk.f32.mxu0 %vm264_vm1, %v5928_v29 }
  0x92   : > { %4748 = vmatmul.mubr.msk.f32.gmra.mrb[30].mxu1 %vm264_vm1, %v6032_v62  ;;  %4974 = vmatmul.mubr.msk.f32.gmra.mrb[14].mxu0 %vm264_vm1, %v5944_v31 }
  0x93   : > { %4752 = vmatprep.mubr.msk.f32.mxu1 %vm264_vm1, %v914_v3  ;;  %4976 = vmatprep.mubr.msk.f32.mxu0 %vm264_vm1, %v5949_v0  ;;  %v6602_v3 = vld [vmem:[#allocation22_spill] sm:$0xff] }
  0x96   : > { %4753 = vmatmul.mubr.msk.f32.vlgmr.msra.gmra.mrb[0].mxu1 %vm264_vm1, %v915_v33  ;;  %4977 = vmatmul.mubr.msk.f32.gmra.mrb[16].mxu0 %vm264_vm1, %v5962_v28  ;;  %v4181_v33 = vld [vmem:[%s5473_s27 + $0x198] sm:$0xff] }
  0x97   : > { %4801 = vmatpush3.msk.msra.mxu1 %vm361_vm0, %v5774_v61  ;;  %4755 = vmatprep.mubr.msk.f32.mxu1 %vm264_vm1, %v5589_v24  ;;  %v6087_v24 = vld [vmem:[%s5473_s27 + $0x180] sm:$0xff] }
  0x98   : > { %4979 = vmatprep.mubr.msk.f32.mxu0 %vm264_vm1, %v5965_v5  ;;  %5100 = vmatprep.subr.msk.mxu1 %vm361_vm0, %v5451_v1  ;;  %v4182_v61 = vld [vmem:[%s5473_s27 + $0x1a0] sm:$0xff] }
  0x9a   : > { %4756 = vmatmul.mubr.msk.f32.gmra.mrb[2].mxu1 %vm264_vm1, %v5600_v25  ;;  %4980 = vmatmul.mubr.msk.f32.gmra.mrb[18].mxu0 %vm264_vm1, %v5976_v7  ;;  %v6098_v25 = vld [vmem:[%s5473_s27 + $0x188] sm:$0xff] }
  0x9b   : > { %4758 = vmatprep.mubr.msk.f32.mxu1 %vm264_vm1, %v5606_v27  ;;  %4982 = vmatprep.mubr.msk.f32.mxu0 %vm264_vm1, %v5979_v10 }
  0x9e   : > { %4759 = vmatmul.mubr.msk.f32.gmra.mrb[4].mxu1 %vm264_vm1, %v5624_v30  ;;  %4983 = vmatmul.mubr.msk.f32.gmra.mrb[20].mxu0 %vm264_vm1, %v5990_v57 }
  0x9f   : > { %4761 = vmatprep.mubr.msk.f32.mxu1 %vm264_vm1, %v5632_v32  ;;  %4985 = vmatprep.mubr.msk.f32.mxu0 %vm264_vm1, %v5993_v51 }
  0xa2   : > { %4762 = vmatmul.mubr.msk.f32.gmra.mrb[6].mxu1 %vm264_vm1, %v5648_v34  ;;  %4986 = vmatmul.mubr.msk.f32.gmra.mrb[22].mxu0 %vm264_vm1, %v6004_v47 }
  0xa3   : > { %4764 = vmatprep.mubr.msk.f32.mxu1 %vm264_vm1, %v5654_v36  ;;  %4988 = vmatprep.mubr.msk.f32.mxu0 %vm264_vm1, %v6007_v43 }
  0xa6   : > { %4765 = vmatmul.mubr.msk.f32.gmra.mrb[8].mxu1 %vm264_vm1, %v5668_v38  ;;  %4989 = vmatmul.mubr.msk.f32.gmra.mrb[24].mxu0 %vm264_vm1, %v6018_v39 }
  0xa7   : > { %4767 = vmatprep.mubr.msk.f32.mxu1 %vm264_vm1, %v5674_v40  ;;  %4991 = vmatprep.mubr.msk.f32.mxu0 %vm264_vm1, %v6021_v35 }
  0xaa   : > { %4768 = vmatmul.mubr.msk.f32.gmra.mrb[10].mxu1 %vm264_vm1, %v5688_v42  ;;  %4992 = vmatmul.mubr.msk.f32.gmra.mrb[26].mxu0 %vm264_vm1, %v6032_v62 }
  0xab   : > { %4770 = vmatprep.mubr.msk.f32.mxu1 %vm264_vm1, %v5694_v44  ;;  %4994 = vmatprep.mubr.msk.f32.mxu0 %vm264_vm1, %v6087_v24 }
  0xae   : > { %4771 = vmatmul.mubr.msk.f32.gmra.mrb[12].mxu1 %vm264_vm1, %v5708_v46  ;;  %4995 = vmatmul.mubr.msk.f32.gmra.mrb[28].mxu0 %vm264_vm1, %v6098_v25 }
  0xaf   : > { %4773 = vmatprep.mubr.msk.f32.mxu1 %vm264_vm1, %v5714_v48  ;;  %4997 = vmatprep.mubr.msk.f32.mxu0 %vm264_vm1, %v4181_v33  ;;  %v6603_v33 = vld [vmem:[#allocation10_spill] sm:$0xff] }
  0xb2   : > { %4774 = vmatmul.mubr.msk.f32.gmra.mrb[14].mxu1 %vm264_vm1, %v5728_v50  ;;  %4998 = vmatmul.mubr.msk.f32.gmra.mrb[30].mxu0 %vm264_vm1, %v4182_v61  ;;  %v6604_v61 = vld [vmem:[#allocation23_spill] sm:$0xff] }
  0xb3   : > { %4776 = vmatprep.mubr.msk.f32.mxu1 %vm264_vm1, %v5734_v52  ;;  %5002 = vmatprep.mubr.msk.f32.mxu0 %vm264_vm1, %v5482_v8  ;;  %v6586_v8 = vld [vmem:[#allocation27_spill] sm:$0xff] }
  0xb6   : > { %4777 = vmatmul.mubr.msk.f32.gmra.mrb[16].mxu1 %vm264_vm1, %v5748_v54  ;;  %5003 = vmatmul.mubr.msk.f32.vlgmr.msra.gmra.mrb[0].mxu0 %vm264_vm1, %v5497_v11  ;;  %v6587_v11 = vld [vmem:[#allocation2_spill] sm:$0xff] }
  0xb7   : > { %5051 = vmatpush3.msk.msra.mxu0 %vm361_vm0, %v5933_v37  ;;  %4779 = vmatprep.mubr.msk.f32.mxu1 %vm264_vm1, %v5752_v56  ;;  %v6601_v37 = vld [vmem:[#allocation9_spill] sm:$0xff] }
  0xb8   : > { %5005 = vmatprep.mubr.msk.f32.mxu0 %vm264_vm1, %v5503_v12  ;;  %v6588_v12 = vld [vmem:[#allocation15_spill] sm:$0xff] }
  0xba   : > { %4780 = vmatmul.mubr.msk.f32.gmra.mrb[18].mxu1 %vm264_vm1, %v5763_v58  ;;  %5006 = vmatmul.mubr.msk.f32.gmra.mrb[2].mxu0 %vm264_vm1, %v5516_v13  ;;  %v6589_v13 = vld [vmem:[#allocation3_spill] sm:$0xff] }
  0xbb   : > { %4782 = vmatprep.mubr.msk.f32.mxu1 %vm264_vm1, %v5769_v60  ;;  %5008 = vmatprep.mubr.msk.f32.mxu0 %vm264_vm1, %v5519_v14  ;;  %v6590_v14 = vld [vmem:[#allocation16_spill] sm:$0xff] }
  0xbe   : > { %4783 = vmatmul.mubr.msk.f32.gmra.mrb[20].mxu1 %vm264_vm1, %v5787_v63  ;;  %5009 = vmatmul.mubr.msk.f32.gmra.mrb[4].mxu0 %vm264_vm1, %v5530_v15  ;;  %v6591_v15 = vld [vmem:[#allocation4_spill] sm:$0xff] }
  0xbf   : > { %4785 = vmatprep.mubr.msk.f32.mxu1 %vm264_vm1, %v5795_v2  ;;  %5011 = vmatprep.mubr.msk.f32.mxu0 %vm264_vm1, %v5533_v16  ;;  %v6592_v16 = vld [vmem:[#allocation17_spill] sm:$0xff] }
  0xc2   : > { %4786 = vmatmul.mubr.msk.f32.gmra.mrb[22].mxu1 %vm264_vm1, %v5811_v4  ;;  %5012 = vmatmul.mubr.msk.f32.gmra.mrb[6].mxu0 %vm264_vm1, %v5544_v17  ;;  %v6593_v17 = vld [vmem:[#allocation5_spill] sm:$0xff] }
  0xc3   : > { %4788 = vmatprep.mubr.msk.f32.mxu1 %vm264_vm1, %v5817_v6  ;;  %5014 = vmatprep.mubr.msk.f32.mxu0 %vm264_vm1, %v5547_v18  ;;  %v6594_v18 = vld [vmem:[#allocation18_spill] sm:$0xff] }
  0xc6   : > { %4789 = vmatmul.mubr.msk.f32.gmra.mrb[24].mxu1 %vm264_vm1, %v5831_v9  ;;  %5015 = vmatmul.mubr.msk.f32.gmra.mrb[8].mxu0 %vm264_vm1, %v5558_v19  ;;  %v6595_v19 = vld [vmem:[#allocation6_spill] sm:$0xff] }
  0xc7   : > { %4791 = vmatprep.mubr.msk.f32.mxu1 %vm264_vm1, %v5837_v55  ;;  %5017 = vmatprep.mubr.msk.f32.mxu0 %vm264_vm1, %v5561_v20  ;;  %v6596_v20 = vld [vmem:[#allocation19_spill] sm:$0xff] }
  0xca   : > { %4792 = vmatmul.mubr.msk.f32.gmra.mrb[26].mxu1 %vm264_vm1, %v5851_v53  ;;  %5018 = vmatmul.mubr.msk.f32.gmra.mrb[10].mxu0 %vm264_vm1, %v5572_v21  ;;  %v6597_v21 = vld [vmem:[#allocation7_spill] sm:$0xff] }
  0xcb   : > { %4794 = vmatprep.mubr.msk.f32.mxu1 %vm264_vm1, %v5857_v49  ;;  %5020 = vmatprep.mubr.msk.f32.mxu0 %vm264_vm1, %v5575_v22  ;;  %v6599_v22 = vld [vmem:[#allocation8_spill] sm:$0xff] }
  0xce   : > { %4795 = vmatmul.mubr.msk.f32.gmra.mrb[28].mxu1 %vm264_vm1, %v5871_v45  ;;  %5021 = vmatmul.mubr.msk.f32.gmra.mrb[12].mxu0 %vm264_vm1, %v5586_v23  ;;  %v6600_v23 = vld [vmem:[#allocation21_spill] sm:$0xff] }
  0xcf   : > { %4797 = vmatprep.mubr.msk.f32.mxu1 %vm264_vm1, %v5877_v41  ;;  %5023 = vmatprep.mubr.msk.f32.mxu0 %vm264_vm1, %v5603_v26 }
  0xd2   : > { %4798 = vmatmul.mubr.msk.f32.gmra.mrb[30].mxu1 %vm264_vm1, %v6586_v8  ;;  %5024 = vmatmul.mubr.msk.f32.gmra.mrb[14].mxu0 %vm264_vm1, %v6587_v11  ;;  %v6613_v8 = vld [vmem:[#allocation30_spill] sm:$0xff] }
  0xd3   : > { %4802 = vmatprep.mubr.msk.f32.mxu1 %vm264_vm1, %v6588_v12  ;;  %5026 = vmatprep.mubr.msk.f32.mxu0 %vm264_vm1, %v6589_v13  ;;  %v6605_v12 = vld [vmem:[#allocation11_spill] sm:$0xff] }
  0xd6   : > { %4803 = vmatmul.mubr.msk.f32.vlgmr.msra.gmra.mrb[0].mxu1 %vm264_vm1, %v6590_v14  ;;  %5027 = vmatmul.mubr.msk.f32.gmra.mrb[16].mxu0 %vm264_vm1, %v6591_v15  ;;  %v6606_v14 = vld [vmem:[#allocation24_spill] sm:$0xff] }
  0xd7   : > { %5101 = vmatpush3.msk.msra.mxu1 %vm361_vm0, %v5451_v1  ;;  %4805 = vmatprep.mubr.msk.f32.mxu1 %vm264_vm1, %v6592_v16  ;;  %v6598_v1 = vld [vmem:[#allocation20_spill] sm:$0xff] }
  0xd8   : > { %5029 = vmatprep.mubr.msk.f32.mxu0 %vm264_vm1, %v6593_v17  ;;  %v6607_v16 = vld [vmem:[#allocation12_spill] sm:$0xff] }
  0xda   : > { %4806 = vmatmul.mubr.msk.f32.gmra.mrb[2].mxu1 %vm264_vm1, %v6594_v18  ;;  %5030 = vmatmul.mubr.msk.f32.gmra.mrb[18].mxu0 %vm264_vm1, %v6595_v19  ;;  %v6608_v18 = vld [vmem:[#allocation25_spill] sm:$0xff] }
  0xdb   : > { %4808 = vmatprep.mubr.msk.f32.mxu1 %vm264_vm1, %v6596_v20  ;;  %5032 = vmatprep.mubr.msk.f32.mxu0 %vm264_vm1, %v6597_v21  ;;  %v6609_v20 = vld [vmem:[#allocation13_spill] sm:$0xff] }
  0xde   : > { %4809 = vmatmul.mubr.msk.f32.gmra.mrb[4].mxu1 %vm264_vm1, %v6598_v1  ;;  %5033 = vmatmul.mubr.msk.f32.gmra.mrb[20].mxu0 %vm264_vm1, %v6599_v22  ;;  %v6225_v1 = vld [vmem:[%s5473_s27 + $0x181] sm:$0xff] }
  0xdf   : > { %4811 = vmatprep.mubr.msk.f32.mxu1 %vm264_vm1, %v6600_v23  ;;  %5035 = vmatprep.mubr.msk.f32.mxu0 %vm264_vm1, %v6601_v37  ;;  %v6610_v23 = vld [vmem:[#allocation26_spill] sm:$0xff] }
  0xe2   : > { %4812 = vmatmul.mubr.msk.f32.gmra.mrb[6].mxu1 %vm264_vm1, %v6602_v3  ;;  %5036 = vmatmul.mubr.msk.f32.gmra.mrb[22].mxu0 %vm264_vm1, %v6603_v33  ;;  %v6611_v3 = vld [vmem:[#allocation14_spill] sm:$0xff] }
  0xe3   : > { %4814 = vmatprep.mubr.msk.f32.mxu1 %vm264_vm1, %v6604_v61  ;;  %5038 = vmatprep.mubr.msk.f32.mxu0 %vm264_vm1, %v6605_v12  ;;  %v6612_v61 = vld [vmem:[#allocation28_spill] sm:$0xff] }
  0xe6   : > { %4815 = vmatmul.mubr.msk.f32.gmra.mrb[8].mxu1 %vm264_vm1, %v6606_v14  ;;  %5039 = vmatmul.mubr.msk.f32.gmra.mrb[24].mxu0 %vm264_vm1, %v6607_v16  ;;  %v6236_v14 = vld [vmem:[%s5473_s27 + $0x189] sm:$0xff] }
  0xe7   : > { %4817 = vmatprep.mubr.msk.f32.mxu1 %vm264_vm1, %v6608_v18  ;;  %5041 = vmatprep.mubr.msk.f32.mxu0 %vm264_vm1, %v6609_v20  ;;  %v4247_v18 = vld [vmem:[%s5473_s27 + $0x199] sm:$0xff] }
  0xea   : > { %4818 = vmatmul.mubr.msk.f32.gmra.mrb[10].mxu1 %vm264_vm1, %v6610_v23  ;;  %5042 = vmatmul.mubr.msk.f32.gmra.mrb[26].mxu0 %vm264_vm1, %v6611_v3  ;;  %v4248_v23 = vld [vmem:[%s5473_s27 + $0x1a1] sm:$0xff]  ;;  %v6614_v3 = vld [vmem:[#allocation32_spill] sm:$0xff] }
  0xeb   : > { %4820 = vmatprep.mubr.msk.f32.mxu1 %vm264_vm1, %v6612_v61  ;;  %5044 = vmatprep.mubr.msk.f32.mxu0 %vm264_vm1, %v6225_v1 }
  0xee   : > { %4821 = vmatmul.mubr.msk.f32.gmra.mrb[12].mxu1 %vm264_vm1, %v6613_v8  ;;  %5045 = vmatmul.mubr.msk.f32.gmra.mrb[28].mxu0 %vm264_vm1, %v6236_v14 }
  0xef   : > { %4823 = vmatprep.mubr.msk.f32.mxu1 %vm264_vm1, %v5914_v59  ;;  %5047 = vmatprep.mubr.msk.f32.mxu0 %vm264_vm1, %v4247_v18 }
  0xf2   : > { %4824 = vmatmul.mubr.msk.f32.gmra.mrb[14].mxu1 %vm264_vm1, %v6614_v3  ;;  %5048 = vmatmul.mubr.msk.f32.gmra.mrb[30].mxu0 %vm264_vm1, %v4248_v23 }
  0xf3   : > { %4826 = vmatprep.mubr.msk.f32.mxu1 %vm264_vm1, %v5928_v29  ;;  %5052 = vmatprep.mubr.msk.f32.mxu0 %vm264_vm1, %v5606_v27  ;;  %v6616_v27 = vld [vmem:[#allocation29_spill] sm:$0xff] }
  0xf4   : > { %v4313_v29 = vld [vmem:[%s5473_s27 + $0x19a] sm:$0xff] }
  0xf6   : > { %4827 = vmatmul.mubr.msk.f32.gmra.mrb[16].mxu1 %vm264_vm1, %v5944_v31  ;;  %5053 = vmatmul.mubr.msk.f32.vlgmr.msra.gmra.mrb[0].mxu0 %vm264_vm1, %v5624_v30  ;;  %v6617_v30 = vld [vmem:[#allocation14_spill] sm:$0xff]  ;;  %v6618_v31 = vld [vmem:[#allocation31_spill] sm:$0xff] }
  0xf7   : > { %4829 = vmatprep.mubr.msk.f32.mxu1 %vm264_vm1, %v5949_v0  ;;  %5055 = vmatprep.mubr.msk.f32.mxu0 %vm264_vm1, %v5632_v32  ;;  %v4314_v32 = vld [vmem:[%s5473_s27 + $0x1a2] sm:$0xff] }
  0xfa   : > { %4830 = vmatmul.mubr.msk.f32.gmra.mrb[18].mxu1 %vm264_vm1, %v5962_v28  ;;  %5056 = vmatmul.mubr.msk.f32.gmra.mrb[2].mxu0 %vm264_vm1, %v5648_v34 }
  0xfb   : > { %4832 = vmatprep.mubr.msk.f32.mxu1 %vm264_vm1, %v5965_v5  ;;  %5058 = vmatprep.mubr.msk.f32.mxu0 %vm264_vm1, %v5654_v36 }
  0xfe   : > { %4833 = vmatmul.mubr.msk.f32.gmra.mrb[20].mxu1 %vm264_vm1, %v5976_v7  ;;  %5059 = vmatmul.mubr.msk.f32.gmra.mrb[4].mxu0 %vm264_vm1, %v5668_v38 }
  0xff   : > { %4835 = vmatprep.mubr.msk.f32.mxu1 %vm264_vm1, %v5979_v10  ;;  %5061 = vmatprep.mubr.msk.f32.mxu0 %vm264_vm1, %v5674_v40 }
 0x102   : > { %4836 = vmatmul.mubr.msk.f32.gmra.mrb[22].mxu1 %vm264_vm1, %v5990_v57  ;;  %5062 = vmatmul.mubr.msk.f32.gmra.mrb[6].mxu0 %vm264_vm1, %v5688_v42 }
 0x103   : > { %4838 = vmatprep.mubr.msk.f32.mxu1 %vm264_vm1, %v5993_v51  ;;  %5064 = vmatprep.mubr.msk.f32.mxu0 %vm264_vm1, %v5694_v44 }
 0x106   : > { %4839 = vmatmul.mubr.msk.f32.gmra.mrb[24].mxu1 %vm264_vm1, %v6004_v47  ;;  %5065 = vmatmul.mubr.msk.f32.gmra.mrb[8].mxu0 %vm264_vm1, %v5708_v46 }
 0x107   : > { %4841 = vmatprep.mubr.msk.f32.mxu1 %vm264_vm1, %v6007_v43  ;;  %5067 = vmatprep.mubr.msk.f32.mxu0 %vm264_vm1, %v5714_v48 }
 0x10a   : > { %4842 = vmatmul.mubr.msk.f32.gmra.mrb[26].mxu1 %vm264_vm1, %v6018_v39  ;;  %5068 = vmatmul.mubr.msk.f32.gmra.mrb[10].mxu0 %vm264_vm1, %v5728_v50 }
 0x10b   : > { %4844 = vmatprep.mubr.msk.f32.mxu1 %vm264_vm1, %v6021_v35  ;;  %5070 = vmatprep.mubr.msk.f32.mxu0 %vm264_vm1, %v5734_v52  ;;  %v6389_v52 = vld [vmem:[%s6508_s2] ss:$0 sm:$0xff] }
 0x10e   : > { %4845 = vmatmul.mubr.msk.f32.gmra.mrb[28].mxu1 %vm264_vm1, %v6032_v62  ;;  %5071 = vmatmul.mubr.msk.f32.gmra.mrb[12].mxu0 %vm264_vm1, %v5748_v54 }
 0x10f   : > { %4847 = vmatprep.mubr.msk.f32.mxu1 %vm264_vm1, %v6087_v24  ;;  %5073 = vmatprep.mubr.msk.f32.mxu0 %vm264_vm1, %v5752_v56 }
 0x112   : > { %4848 = vmatmul.mubr.msk.f32.gmra.mrb[30].mxu1 %vm264_vm1, %v6098_v25  ;;  %5074 = vmatmul.mubr.msk.f32.gmra.mrb[14].mxu0 %vm264_vm1, %v5763_v58 }
 0x113   : > { %4876 = vmatprep.mubr.msk.f32.mxu1 %vm264_vm1, %v5603_v26  ;;  %5076 = vmatprep.mubr.msk.f32.mxu0 %vm264_vm1, %v5769_v60  ;;  %v6615_v26 = vld [vmem:[#allocation27_spill] sm:$0xff] }
 0x116   : > { %4877 = vmatmul.mubr.msk.f32.vlgmr.msra.gmra.mrb[16].mxu1 %vm264_vm1, %v6587_v11  ;;  %5077 = vmatmul.mubr.msk.f32.gmra.mrb[16].mxu0 %vm264_vm1, %v5787_v63 }
 0x117   : > { %4879 = vmatprep.mubr.msk.f32.mxu1 %vm264_vm1, %v6589_v13  ;;  %5079 = vmatprep.mubr.msk.f32.mxu0 %vm264_vm1, %v5795_v2 }
 0x11a   : > { %4880 = vmatmul.mubr.msk.f32.gmra.mrb[18].mxu1 %vm264_vm1, %v6591_v15  ;;  %5080 = vmatmul.mubr.msk.f32.gmra.mrb[18].mxu0 %vm264_vm1, %v5811_v4 }
 0x11b   : > { %4882 = vmatprep.mubr.msk.f32.mxu1 %vm264_vm1, %v6593_v17  ;;  %5082 = vmatprep.mubr.msk.f32.mxu0 %vm264_vm1, %v5817_v6 }
 0x11e   : > { %4883 = vmatmul.mubr.msk.f32.gmra.mrb[20].mxu1 %vm264_vm1, %v6595_v19  ;;  %5083 = vmatmul.mubr.msk.f32.gmra.mrb[20].mxu0 %vm264_vm1, %v5831_v9 }
 0x11f   : > { %4885 = vmatprep.mubr.msk.f32.mxu1 %vm264_vm1, %v6597_v21  ;;  %5085 = vmatprep.mubr.msk.f32.mxu0 %vm264_vm1, %v5837_v55 }
 0x122   : > { %4886 = vmatmul.mubr.msk.f32.gmra.mrb[22].mxu1 %vm264_vm1, %v6599_v22  ;;  %5086 = vmatmul.mubr.msk.f32.gmra.mrb[22].mxu0 %vm264_vm1, %v5851_v53 }
 0x123   : > { %4888 = vmatprep.mubr.msk.f32.mxu1 %vm264_vm1, %v6601_v37  ;;  %5088 = vmatprep.mubr.msk.f32.mxu0 %vm264_vm1, %v5857_v49 }
 0x126   : > { %4889 = vmatmul.mubr.msk.f32.gmra.mrb[24].mxu1 %vm264_vm1, %v6603_v33  ;;  %5089 = vmatmul.mubr.msk.f32.gmra.mrb[24].mxu0 %vm264_vm1, %v5871_v45 }
 0x127   : > { %4891 = vmatprep.mubr.msk.f32.mxu1 %vm264_vm1, %v6605_v12  ;;  %5091 = vmatprep.mubr.msk.f32.mxu0 %vm264_vm1, %v5877_v41 }
 0x12a   : > { %4892 = vmatmul.mubr.msk.f32.gmra.mrb[26].mxu1 %vm264_vm1, %v6607_v16  ;;  %5092 = vmatmul.mubr.msk.f32.gmra.mrb[26].mxu0 %vm264_vm1, %v6615_v26 }
 0x12b   : > { %4894 = vmatprep.mubr.msk.f32.mxu1 %vm264_vm1, %v6609_v20  ;;  %5094 = vmatprep.mubr.msk.f32.mxu0 %vm264_vm1, %v6616_v27 }
 0x12e   : > { %4895 = vmatmul.mubr.msk.f32.gmra.mrb[28].mxu1 %vm264_vm1, %v6617_v30  ;;  %5095 = vmatmul.mubr.msk.f32.gmra.mrb[28].mxu0 %vm264_vm1, %v6618_v31 }
 0x12f   : > { %4897 = vmatprep.mubr.msk.f32.mxu1 %vm264_vm1, %v6225_v1  ;;  %5097 = vmatprep.mubr.msk.f32.mxu0 %vm264_vm1, %v4313_v29 }
 0x132   : > { %4898 = vmatmul.mubr.msk.f32.gmra.mrb[30].mxu1 %vm264_vm1, %v6236_v14  ;;  %5098 = vmatmul.mubr.msk.f32.gmra.mrb[30].mxu0 %vm264_vm1, %v4314_v32 }
 0x1a9   : > { %v4804_v34 = vpop.f32.mrb[0].mxu1 }
 0x1aa   : > { %v1506_v35 = vpop.f32.mrb[1].mxu1 }
 0x1ad   : > { %v4807_v36 = vpop.f32.mrb[2].mxu1 }
 0x1ae   : > { %v1516_v38 = vpop.f32.mrb[3].mxu1 }
 0x1b1   : > { %v4810_v39 = vpop.f32.mrb[4].mxu1 }
 0x1b2   : > { %v1526_v40 = vpop.f32.mrb[5].mxu1 }
 0x1b5   : > { %v4813_v41 = vpop.f32.mrb[6].mxu1 }
 0x1b6   : > { %v1536_v42 = vpop.f32.mrb[7].mxu1 }
 0x1b9   : > { %v4816_v43 = vpop.f32.mrb[8].mxu1 }
 0x1ba   : > { %v1546_v44 = vpop.f32.mrb[9].mxu1 }
 0x1bd   : > { %v4819_v45 = vpop.f32.mrb[10].mxu1 }
 0x1be   : > { %v1556_v46 = vpop.f32.mrb[11].mxu1 }
 0x1c1   : > { %v6378_v47 = vpop.f32.mrb[12].mxu1 }
 0x1c2   : > { %v6380_v48 = vpop.f32.mrb[13].mxu1 }
 0x1c5   : > { %v6382_v49 = vpop.f32.mrb[14].mxu1 }
 0x1c6   : > { %v6384_v50 = vpop.f32.mrb[15].mxu1 }
 0x1c9   : > { %v5054_v51 = vpop.f32.mrb[0].mxu0 }
 0x1ca   : > { %v5102_v53 = vadd.f32 %v5054_v51, %v4804_v34  ;;  %v3459_v54 = vpop.f32.mrb[1].mxu0 }
 0x1cb   : > { %v5103_v56 = vadd.f32 %v3459_v54, %v1506_v35 }
 0x1cc   : > { %v3658_v58 = vadd.f32 %v5102_v53, %v6389_v52 }
 0x1cd   : > { %v3657_v59 = vadd.f32 %v5103_v56, %v6389_v52  ;;  %v5057_v60 = vpop.f32.mrb[2].mxu0 }
 0x1ce   : > { %v3690_v62 = vmax.f32 %v3658_v58, 0.0  ;;  %v5104_v63 = vadd.f32 %v5057_v60, %v4807_v36  ;;  %v3469_v0 = vpop.f32.mrb[3].mxu0 }
 0x1cf   : > { %v3689_v2 = vmax.f32 %v3657_v59, 0.0  ;;  %v5105_v4 = vadd.f32 %v3469_v0, %v1516_v38 }
 0x1d0   : > { %3722 = vst.msk [vmem:[%s6396_s20 + $0x8] sm:$0xff] %vm264_vm1, %v3690_v62  ;;  %v3660_v5 = vadd.f32 %v5104_v63, %v6389_v52 }
 0x1d1   : > { %3721 = vst.msk [vmem:[%s6396_s20] sm:$0xff] %vm264_vm1, %v3689_v2  ;;  %v3659_v6 = vadd.f32 %v5105_v4, %v6389_v52  ;;  %v5060_v7 = vpop.f32.mrb[4].mxu0 }
 0x1d2   : > { %v3692_v9 = vmax.f32 %v3660_v5, 0.0  ;;  %v5106_v10 = vadd.f32 %v5060_v7, %v4810_v39  ;;  %v3479_v55 = vpop.f32.mrb[5].mxu0 }
 0x1d3   : > { %v3691_v57 = vmax.f32 %v3659_v6, 0.0  ;;  %v5107_v28 = vadd.f32 %v3479_v55, %v1526_v40 }
 0x1d4   : > { %3724 = vst.msk [vmem:[%s6396_s20 + $0x18] sm:$0xff] %vm264_vm1, %v3692_v9  ;;  %v3662_v24 = vadd.f32 %v5106_v10, %v6389_v52 }
 0x1d5   : > { %3723 = vst.msk [vmem:[%s6396_s20 + $0x10] sm:$0xff] %vm264_vm1, %v3691_v57  ;;  %v3661_v25 = vadd.f32 %v5107_v28, %v6389_v52  ;;  %v5063_v8 = vpop.f32.mrb[6].mxu0 }
 0x1d6   : > { %v3694_v11 = vmax.f32 %v3662_v24, 0.0  ;;  %v5108_v13 = vadd.f32 %v5063_v8, %v4813_v41  ;;  %v3489_v15 = vpop.f32.mrb[7].mxu0 }
 0x1d7   : > { %v3693_v17 = vmax.f32 %v3661_v25, 0.0  ;;  %v5109_v19 = vadd.f32 %v3489_v15, %v1536_v42 }
 0x1d8   : > { %3726 = vst.msk [vmem:[%s6396_s20 + $0x28] sm:$0xff] %vm264_vm1, %v3694_v11  ;;  %v3664_v21 = vadd.f32 %v5108_v13, %v6389_v52 }
 0x1d9   : > { %3725 = vst.msk [vmem:[%s6396_s20 + $0x20] sm:$0xff] %vm264_vm1, %v3693_v17  ;;  %v3663_v22 = vadd.f32 %v5109_v19, %v6389_v52  ;;  %v5066_v37 = vpop.f32.mrb[8].mxu0 }
 0x1da   : > { %v3696_v33 = vmax.f32 %v3664_v21, 0.0  ;;  %v5110_v12 = vadd.f32 %v5066_v37, %v4816_v43  ;;  %v3499_v16 = vpop.f32.mrb[9].mxu0 }
 0x1db   : > { %v3695_v20 = vmax.f32 %v3663_v22, 0.0  ;;  %v5111_v1 = vadd.f32 %v3499_v16, %v1546_v44 }
 0x1dc   : > { %3728 = vst.msk [vmem:[%s6396_s20 + $0x38] sm:$0xff] %vm264_vm1, %v3696_v33  ;;  %v3666_v3 = vadd.f32 %v5110_v12, %v6389_v52 }
 0x1dd   : > { %3727 = vst.msk [vmem:[%s6396_s20 + $0x30] sm:$0xff] %vm264_vm1, %v3695_v20  ;;  %v3665_v61 = vadd.f32 %v5111_v1, %v6389_v52  ;;  %v5069_v14 = vpop.f32.mrb[10].mxu0 }
 0x1de   : > { %v3698_v18 = vmax.f32 %v3666_v3, 0.0  ;;  %v5112_v23 = vadd.f32 %v5069_v14, %v4819_v45  ;;  %v3509_v26 = vpop.f32.mrb[11].mxu0 }
 0x1df   : > { %v3697_v27 = vmax.f32 %v3665_v61, 0.0  ;;  %v5113_v29 = vadd.f32 %v3509_v26, %v1556_v46 }
 0x1e0   : > { %3730 = vst.msk [vmem:[%s6396_s20 + $0x48] sm:$0xff] %vm264_vm1, %v3698_v18  ;;  %v3668_v30 = vadd.f32 %v5112_v23, %v6389_v52 }
 0x1e1   : > { %3729 = vst.msk [vmem:[%s6396_s20 + $0x40] sm:$0xff] %vm264_vm1, %v3697_v27  ;;  %v3667_v31 = vadd.f32 %v5113_v29, %v6389_v52  ;;  %v5072_v32 = vpop.f32.mrb[12].mxu0 }
 0x1e2   : > { %v3700_v34 = vmax.f32 %v3668_v30, 0.0  ;;  %v5114_v35 = vadd.f32 %v5072_v32, %v6378_v47  ;;  %v3519_v36 = vpop.f32.mrb[13].mxu0 }
 0x1e3   : > { %v3699_v38 = vmax.f32 %v3667_v31, 0.0  ;;  %v5115_v39 = vadd.f32 %v3519_v36, %v6380_v48 }
 0x1e4   : > { %3732 = vst.msk [vmem:[%s6396_s20 + $0x58] sm:$0xff] %vm264_vm1, %v3700_v34  ;;  %v3670_v40 = vadd.f32 %v5114_v35, %v6389_v52 }
 0x1e5   : > { %3731 = vst.msk [vmem:[%s6396_s20 + $0x50] sm:$0xff] %vm264_vm1, %v3699_v38  ;;  %v3669_v41 = vadd.f32 %v5115_v39, %v6389_v52  ;;  %v5075_v42 = vpop.f32.mrb[14].mxu0 }
 0x1e6   : > { %v3702_v43 = vmax.f32 %v3670_v40, 0.0  ;;  %v5116_v44 = vadd.f32 %v5075_v42, %v6382_v49  ;;  %v3529_v45 = vpop.f32.mrb[15].mxu0 }
 0x1e7   : > { %v3701_v46 = vmax.f32 %v3669_v41, 0.0  ;;  %v5117_v47 = vadd.f32 %v3529_v45, %v6384_v50 }
 0x1e8   : > { %3734 = vst.msk [vmem:[%s6396_s20 + $0x68] sm:$0xff] %vm264_vm1, %v3702_v43  ;;  %v3672_v48 = vadd.f32 %v5116_v44, %v6389_v52 }
 0x1e9   : > { %3733 = vst.msk [vmem:[%s6396_s20 + $0x60] sm:$0xff] %vm264_vm1, %v3701_v46  ;;  %v3671_v51 = vadd.f32 %v5117_v47, %v6389_v52  ;;  %v4878_v53 = vpop.f32.mrb[16].mxu1  ;;  %v5078_v54 = vpop.f32.mrb[16].mxu0 }
 0x1ea   : > { %v3704_v56 = vmax.f32 %v3672_v48, 0.0  ;;  %v5118_v58 = vadd.f32 %v5078_v54, %v4878_v53  ;;  %v1976_v59 = vpop.f32.mrb[17].mxu1  ;;  %v3539_v49 = vpop.f32.mrb[17].mxu0 }
 0x1eb   : > { %v3703_v60 = vmax.f32 %v3671_v51, 0.0  ;;  %v5119_v62 = vadd.f32 %v3539_v49, %v1976_v59 }
 0x1ec   : > { %3736 = vst.msk [vmem:[%s6396_s20 + $0x78] sm:$0xff] %vm264_vm1, %v3704_v56  ;;  %v3674_v50 = vadd.f32 %v5118_v58, %v6389_v52 }
 0x1ed   : > { %3735 = vst.msk [vmem:[%s6396_s20 + $0x70] sm:$0xff] %vm264_vm1, %v3703_v60  ;;  %v3673_v63 = vadd.f32 %v5119_v62, %v6389_v52  ;;  %v4881_v0 = vpop.f32.mrb[18].mxu1  ;;  %v5081_v2 = vpop.f32.mrb[18].mxu0 }
 0x1ee   : > { %v3706_v4 = vmax.f32 %v3674_v50, 0.0  ;;  %v5120_v5 = vadd.f32 %v5081_v2, %v4881_v0  ;;  %v1986_v6 = vpop.f32.mrb[19].mxu1  ;;  %v3549_v7 = vpop.f32.mrb[19].mxu0 }
 0x1ef   : > { %v3705_v9 = vmax.f32 %v3673_v63, 0.0  ;;  %v5121_v10 = vadd.f32 %v3549_v7, %v1986_v6 }
 0x1f0   : > { %3738 = vst.msk [vmem:[%s6396_s20 + $0x88] sm:$0xff] %vm264_vm1, %v3706_v4  ;;  %v3676_v55 = vadd.f32 %v5120_v5, %v6389_v52 }
 0x1f1   : > { %3737 = vst.msk [vmem:[%s6396_s20 + $0x80] sm:$0xff] %vm264_vm1, %v3705_v9  ;;  %v3675_v57 = vadd.f32 %v5121_v10, %v6389_v52  ;;  %v4884_v28 = vpop.f32.mrb[20].mxu1  ;;  %v5084_v24 = vpop.f32.mrb[20].mxu0 }
 0x1f2   : > { %v3708_v25 = vmax.f32 %v3676_v55, 0.0  ;;  %v5122_v8 = vadd.f32 %v5084_v24, %v4884_v28  ;;  %v1996_v11 = vpop.f32.mrb[21].mxu1  ;;  %v3559_v13 = vpop.f32.mrb[21].mxu0 }
 0x1f3   : > { %v3707_v15 = vmax.f32 %v3675_v57, 0.0  ;;  %v5123_v17 = vadd.f32 %v3559_v13, %v1996_v11 }
 0x1f4   : > { %3740 = vst.msk [vmem:[%s6396_s20 + $0x98] sm:$0xff] %vm264_vm1, %v3708_v25  ;;  %v3678_v19 = vadd.f32 %v5122_v8, %v6389_v52 }
 0x1f5   : > { %3739 = vst.msk [vmem:[%s6396_s20 + $0x90] sm:$0xff] %vm264_vm1, %v3707_v15  ;;  %v3677_v21 = vadd.f32 %v5123_v17, %v6389_v52  ;;  %v4887_v22 = vpop.f32.mrb[22].mxu1  ;;  %v5087_v37 = vpop.f32.mrb[22].mxu0 }
 0x1f6   : > { %v3710_v33 = vmax.f32 %v3678_v19, 0.0  ;;  %v5124_v12 = vadd.f32 %v5087_v37, %v4887_v22  ;;  %v2006_v16 = vpop.f32.mrb[23].mxu1  ;;  %v3569_v20 = vpop.f32.mrb[23].mxu0 }
 0x1f7   : > { %v3709_v1 = vmax.f32 %v3677_v21, 0.0  ;;  %v5125_v3 = vadd.f32 %v3569_v20, %v2006_v16 }
 0x1f8   : > { %3742 = vst.msk [vmem:[%s6396_s20 + $0xa8] sm:$0xff] %vm264_vm1, %v3710_v33  ;;  %v3680_v61 = vadd.f32 %v5124_v12, %v6389_v52 }
 0x1f9   : > { %3741 = vst.msk [vmem:[%s6396_s20 + $0xa0] sm:$0xff] %vm264_vm1, %v3709_v1  ;;  %v3679_v14 = vadd.f32 %v5125_v3, %v6389_v52  ;;  %v4890_v18 = vpop.f32.mrb[24].mxu1  ;;  %v5090_v23 = vpop.f32.mrb[24].mxu0 }
 0x1fa   : > { %v3712_v26 = vmax.f32 %v3680_v61, 0.0  ;;  %v5126_v27 = vadd.f32 %v5090_v23, %v4890_v18  ;;  %v2016_v29 = vpop.f32.mrb[25].mxu1  ;;  %v3579_v30 = vpop.f32.mrb[25].mxu0 }
 0x1fb   : > { %v3711_v31 = vmax.f32 %v3679_v14, 0.0  ;;  %v5127_v32 = vadd.f32 %v3579_v30, %v2016_v29 }
 0x1fc   : > { %3744 = vst.msk [vmem:[%s6396_s20 + $0xb8] sm:$0xff] %vm264_vm1, %v3712_v26  ;;  %v3682_v34 = vadd.f32 %v5126_v27, %v6389_v52 }
 0x1fd   : > { %3743 = vst.msk [vmem:[%s6396_s20 + $0xb0] sm:$0xff] %vm264_vm1, %v3711_v31  ;;  %v3681_v35 = vadd.f32 %v5127_v32, %v6389_v52  ;;  %v4893_v36 = vpop.f32.mrb[26].mxu1  ;;  %v5093_v38 = vpop.f32.mrb[26].mxu0 }
 0x1fe   : > { %v3714_v39 = vmax.f32 %v3682_v34, 0.0  ;;  %v5128_v40 = vadd.f32 %v5093_v38, %v4893_v36  ;;  %v2026_v41 = vpop.f32.mrb[27].mxu1  ;;  %v3589_v42 = vpop.f32.mrb[27].mxu0 }
 0x1ff   : > { %v3713_v43 = vmax.f32 %v3681_v35, 0.0  ;;  %v5129_v44 = vadd.f32 %v3589_v42, %v2026_v41 }
 0x200   : > { %3746 = vst.msk [vmem:[%s6396_s20 + $0xc8] sm:$0xff] %vm264_vm1, %v3714_v39  ;;  %v3684_v45 = vadd.f32 %v5128_v40, %v6389_v52 }
 0x201   : > { %3745 = vst.msk [vmem:[%s6396_s20 + $0xc0] sm:$0xff] %vm264_vm1, %v3713_v43  ;;  %v3683_v46 = vadd.f32 %v5129_v44, %v6389_v52  ;;  %v4896_v47 = vpop.f32.mrb[28].mxu1  ;;  %v5096_v48 = vpop.f32.mrb[28].mxu0 }
 0x202   : > { %v3716_v51 = vmax.f32 %v3684_v45, 0.0  ;;  %v5130_v53 = vadd.f32 %v5096_v48, %v4896_v47  ;;  %v2036_v54 = vpop.f32.mrb[29].mxu1  ;;  %v3599_v56 = vpop.f32.mrb[29].mxu0 }
 0x203   : > { %v3715_v58 = vmax.f32 %v3683_v46, 0.0  ;;  %v5131_v59 = vadd.f32 %v3599_v56, %v2036_v54 }
 0x204   : > { %3748 = vst.msk [vmem:[%s6396_s20 + $0xd8] sm:$0xff] %vm264_vm1, %v3716_v51  ;;  %v3686_v49 = vadd.f32 %v5130_v53, %v6389_v52 }
 0x205   : > { %3747 = vst.msk [vmem:[%s6396_s20 + $0xd0] sm:$0xff] %vm264_vm1, %v3715_v58  ;;  %v3685_v60 = vadd.f32 %v5131_v59, %v6389_v52  ;;  %v4899_v62 = vpop.f32.mrb[30].mxu1  ;;  %v5099_v50 = vpop.f32.mrb[30].mxu0 }
 0x206   : > { %v3718_v63 = vmax.f32 %v3686_v49, 0.0  ;;  %v5132_v0 = vadd.f32 %v5099_v50, %v4899_v62  ;;  %v2046_v2 = vpop.f32.mrb[31].mxu1  ;;  %v3609_v4 = vpop.f32.mrb[31].mxu0 }
 0x207   : > { %v3717_v5 = vmax.f32 %v3685_v60, 0.0  ;;  %v5133_v6 = vadd.f32 %v3609_v4, %v2046_v2 }
 0x208   : > { %3750 = vst.msk [vmem:[%s6396_s20 + $0xe8] sm:$0xff] %vm264_vm1, %v3718_v63  ;;  %v3688_v7 = vadd.f32 %v5132_v0, %v6389_v52 }
 0x209   : > { %3749 = vst.msk [vmem:[%s6396_s20 + $0xe0] sm:$0xff] %vm264_vm1, %v3717_v5  ;;  %v3687_v9 = vadd.f32 %v5133_v6, %v6389_v52 }
 0x20a   : > { %v3720_v10 = vmax.f32 %v3688_v7, 0.0 }
 0x20b   : > { %v3719_v55 = vmax.f32 %v3687_v9, 0.0 }
 0x20c   : > { %3752 = vst.msk [vmem:[%s6396_s20 + $0xf8] sm:$0xff] %vm264_vm1, %v3720_v10 }
 0x20d   : > { %3751 = vst.msk [vmem:[%s6396_s20 + $0xf0] sm:$0xff] %vm264_vm1, %v3719_v55 }
 0x20e PF: > { %s13_s14 = sadd.s32 1, %s5405_s14   ;;  %s6619_s12 = smov %s5401_s13 }
 0x20f   : > { %p10_p5 = scmp.ge.s32.totalorder %s13_s14, 4   ;;  %s6620_s13 = smov %s6622_s15 }
 0x211   :  { %12 = sbr.rel (!%p10_p5) target bundleno = 2 (0x2), region = 73 }

</bundles_post_ra>
